<compile_context>
chip_gen: v7x
topology: tpu7x:2x2x1
jax: 0.10.0
libtpu: 0.0.40
codegen_flags: <defaults>
</compile_context>

<pallas_src>
import functools

import jax
import jax.numpy as jnp
from jax import lax
from jax.experimental import pallas as pl
from jax.experimental.pallas import tpu as pltpu

CP = 128           # padded channel width (lane-dense tiles)
KH1 = KW1 = 7      # conv1 kernel size (fixed by the PyTorch module)
KH2 = KW2 = 3      # conv2 kernel size
KH3 = KW3 = 3      # conv3 kernel size


def _round_up(x, m):
    return ((x + m - 1) // m) * m


# ---------------------------------------------------------------------------
# In-kernel helpers (operate on values; everything stays in VMEM / registers)
# ---------------------------------------------------------------------------
def _maxpool2x2(a):
    """Floor-mode 2x2 max-pool of a (H, W, C) value via reshape + reduce."""
    H, W, C = a.shape
    Hh, Wh = H // 2, W // 2
    a = a[:2 * Hh, :2 * Wh, :]
    a = jnp.max(a.reshape(Hh, 2, 2 * Wh, C), axis=1)   # row pairs (batch axis)
    a = jnp.max(a.reshape(Hh, Wh, 2, C), axis=2)       # col pairs (sublane axis)
    return a


def _im2col(a, kh, kw):
    """(H, W, C) value -> ((H-kh+1)*(W-kw+1), kh*kw*C) LHS, taps folded into K."""
    H, W, C = a.shape
    Ho, Wo = H - kh + 1, W - kw + 1
    cols = [a[di:di + Ho, dj:dj + Wo, :].reshape(Ho * Wo, C)
            for di in range(kh) for dj in range(kw)]
    return jnp.concatenate(cols, axis=-1), Ho, Wo


# ---------------------------------------------------------------------------
# Fused forward kernel: conv1+ReLU, conv2+ReLU, maxpool, conv3+ReLU, maxpool,
# adaptive-avgpool(1,1), Linear.  One batch element per grid step; all
# activations are values (no HBM round trips, no VMEM scratch buffers).
# ---------------------------------------------------------------------------
def _fused_forward_kernel(xcol_ref, w1_ref, b1_ref, w2_ref, b2_ref,
                          w3_ref, b3_ref, wfc_ref, bfc_ref, o_ref):
    f32, bf16 = jnp.float32, jnp.bfloat16
    _, Ho1, Wo1, K1 = xcol_ref.shape
    Cp = w1_ref.shape[-1]

    # ---- conv1 (7x7): im2col LHS built in the wrapper -> single MXU matmul.
    lhs1 = xcol_ref[0].reshape(Ho1 * Wo1, K1)                       # bf16
    a1 = jnp.dot(lhs1, w1_ref[...], preferred_element_type=f32)
    a1 = jnp.maximum(a1 + b1_ref[...], 0.0)
    a1 = a1.astype(bf16).reshape(Ho1, Wo1, Cp)                      # cast once

    # ---- conv2 (3x3): all 9 taps folded into K -> one (M, 9*Cp) matmul.
    lhs2, Ho2, Wo2 = _im2col(a1, KH2, KW2)
    a2 = jnp.dot(lhs2, w2_ref[...], preferred_element_type=f32)
    a2 = jnp.maximum(a2 + b2_ref[...], 0.0).reshape(Ho2, Wo2, Cp)

    # ---- maxpool 2x2 (dropout1: identity in eval).
    p1 = _maxpool2x2(a2).astype(bf16)                               # cast once

    # ---- conv3 (3x3): taps folded into K -> one matmul.
    lhs3, Ho3, Wo3 = _im2col(p1, KH3, KW3)
    a3 = jnp.dot(lhs3, w3_ref[...], preferred_element_type=f32)
    a3 = jnp.maximum(a3 + b3_ref[...], 0.0).reshape(Ho3, Wo3, Cp)

    # ---- maxpool 2x2 (dropout2: identity) + AdaptiveAvgPool2d((1,1)).
    p2 = _maxpool2x2(a3)
    Hq, Wq, _ = p2.shape
    feat = jnp.sum(p2.reshape(Hq * Wq, Cp), axis=0, keepdims=True)
    feat = feat * (1.0 / float(Hq * Wq))                            # (1, Cp) f32

    # ---- fc: bf16 matmul, f32 accumulate; 128-lane-padded output store.
    logits = jnp.dot(feat.astype(bf16), wfc_ref[...],
                     preferred_element_type=f32) + bfc_ref[...]
    o_ref[...] = logits.reshape(1, 1, Cp).astype(o_ref.dtype)


# ---------------------------------------------------------------------------
# Host-side parameter preparation (one-time): im2col / tap-fold the conv
# weights, zero-pad channels to CP=128 (mathematically exact) and cast bf16.
# ---------------------------------------------------------------------------
def _prepare_params(params):
    def pad_last(a, n):
        pads = [(0, 0)] * (a.ndim - 1) + [(0, n - a.shape[-1])]
        return jnp.pad(a, pads)

    w1, b1 = params["w1"], params["b1"]          # (7,7,3,32),   (32,)
    w2, b2 = params["w2"], params["b2"]          # (3,3,32,64),  (64,)
    w3, b3 = params["w3"], params["b3"]          # (3,3,64,128), (128,)
    wfc, bfc = params["wfc"], params["bfc"]      # (128, nc),    (nc,)

    kh1, kw1, cin1, _ = w1.shape
    K1 = kh1 * kw1 * cin1
    K1P = _round_up(K1, 128)
    # conv1 im2col weight: rows ordered (di, dj, cin) to match wrapper patches.
    w1c = w1.reshape(K1, -1)
    w1c = jnp.pad(w1c, ((0, K1P - K1), (0, 0)))
    w1c = pad_last(w1c, CP).astype(jnp.bfloat16)                   # (256, 128)

    def fold_taps(w):                                              # (kh,kw,ci,co)
        w = jnp.pad(w, ((0, 0), (0, 0),
                        (0, CP - w.shape[2]), (0, CP - w.shape[3])))
        return w.reshape(-1, CP).astype(jnp.bfloat16)              # (kh*kw*CP, CP)

    w2c = fold_taps(w2)                                            # (1152, 128)
    w3c = fold_taps(w3)                                            # (1152, 128)

    b1p = pad_last(b1, CP).reshape(1, CP).astype(jnp.float32)
    b2p = pad_last(b2, CP).reshape(1, CP).astype(jnp.float32)
    b3p = pad_last(b3, CP).reshape(1, CP).astype(jnp.float32)

    wfcp = pad_last(wfc, CP).astype(jnp.bfloat16)                  # (128, 128)
    bfcp = pad_last(bfc.reshape(1, -1), CP).astype(jnp.float32)    # (1, 128)
    return (w1c, b1p, w2c, b2p, w3c, b3p, wfcp, bfcp)


# ---------------------------------------------------------------------------
# Forward pass: single fused pallas_call, grid over batch ("parallel").
# ---------------------------------------------------------------------------
@functools.partial(jax.jit, static_argnames=("num_classes",))
def base_model_forward(prepared, x_nchw, *, num_classes):
    w1c, b1p, w2c, b2p, w3c, b3p, wfcp, bfcp = prepared
    x = jnp.transpose(x_nchw, (0, 2, 3, 1)).astype(jnp.float32)    # NCHW -> NHWC
    N, Hin, Win, _ = x.shape
    Ho1, Wo1 = Hin - KH1 + 1, Win - KW1 + 1
    Cp = w1c.shape[-1]
    K1P = w1c.shape[0]

    # conv1 im2col in the wrapper (tiny here): lane dim becomes K=7*7*Cin,
    # zero-padded to a 128 multiple; cast once to bf16 (halves input DMA).
    patches = [x[:, di:di + Ho1, dj:dj + Wo1, :]
               for di in range(KH1) for dj in range(KW1)]
    xcol = jnp.concatenate(patches, axis=-1).astype(jnp.bfloat16)  # (N,Ho1,Wo1,147)
    K1 = xcol.shape[-1]
    if K1P > K1:
        xcol = jnp.pad(xcol, ((0, 0), (0, 0), (0, 0), (0, K1P - K1)))

    def rep(arr):          # replicated weight operand (same block every step)
        return pl.BlockSpec(arr.shape, lambda b: (0, 0))

    out = pl.pallas_call(
        _fused_forward_kernel,
        out_shape=jax.ShapeDtypeStruct((N, 1, Cp), jnp.float32),
        grid=(N,),
        in_specs=[
            pl.BlockSpec((1, Ho1, Wo1, K1P), lambda b: (b, 0, 0, 0)),
            rep(w1c), rep(b1p), rep(w2c), rep(b2p),
            rep(w3c), rep(b3p), rep(wfcp), rep(bfcp),
        ],
        out_specs=pl.BlockSpec((1, 1, Cp), lambda b: (b, 0, 0)),
        compiler_params=pltpu.CompilerParams(
            dimension_semantics=("parallel",)),
    )(xcol, w1c, b1p, w2c, b2p, w3c, b3p, wfcp, bfcp)
    return out[:, 0, :num_classes]


# ---------------------------------------------------------------------------
# Parameters + pure-JAX reference (f32) for the correctness check
# ---------------------------------------------------------------------------
def init_params(key, num_classes):
    ks = jax.random.split(key, 8)

    def conv_w(k, kh, kw, cin, cout):
        fan_in = kh * kw * cin
        return (jax.random.normal(k, (kh, kw, cin, cout), jnp.float32)
                / jnp.sqrt(float(fan_in)))

    return {
        "w1": conv_w(ks[0], 7, 7, 3, 32),
        "b1": 0.01 * jax.random.normal(ks[1], (32,), jnp.float32),
        "w2": conv_w(ks[2], 3, 3, 32, 64),
        "b2": 0.01 * jax.random.normal(ks[3], (64,), jnp.float32),
        "w3": conv_w(ks[4], 3, 3, 64, 128),
        "b3": 0.01 * jax.random.normal(ks[5], (128,), jnp.float32),
        "wfc": (jax.random.normal(ks[6], (128, num_classes), jnp.float32)
                / jnp.sqrt(128.0)),
        "bfc": 0.01 * jax.random.normal(ks[7], (num_classes,), jnp.float32),
    }


def reference_forward(params, x_nchw):
    dn = ("NHWC", "HWIO", "NHWC")
    x = jnp.transpose(x_nchw, (0, 2, 3, 1)).astype(jnp.float32)

    def conv(y, w, b):
        y = lax.conv_general_dilated(y, w, (1, 1), "VALID",
                                     dimension_numbers=dn)
        return y + b.reshape(1, 1, 1, -1)

    def pool(y):
        return lax.reduce_window(y, -jnp.inf, lax.max,
                                 (1, 2, 2, 1), (1, 2, 2, 1), "VALID")

    y = jax.nn.relu(conv(x, params["w1"], params["b1"]))
    y = jax.nn.relu(conv(y, params["w2"], params["b2"]))
    y = pool(y)                                   # dropout1: identity (eval)
    y = jax.nn.relu(conv(y, params["w3"], params["b3"]))
    y = pool(y)                                   # dropout2: identity (eval)
    y = jnp.mean(y, axis=(1, 2))                  # AdaptiveAvgPool2d((1,1))
    return y @ params["wfc"] + params["bfc"]


if __name__ == "__main__":
    num_classes = 4
    key = jax.random.PRNGKey(0)
    k_param, k_x = jax.random.split(key)
    params = init_params(k_param, num_classes)
    x = jax.random.normal(k_x, (2, 3, 16, 16), jnp.float32)   # NCHW like PyTorch

    prepared = _prepare_params(params)
    out = jax.block_until_ready(
        base_model_forward(prepared, x, num_classes=num_classes))
    assert out.shape == (2, num_classes), out.shape
    assert bool(jnp.all(jnp.isfinite(out)))

    ref = jax.block_until_ready(reference_forward(params, x))
    err = float(jnp.max(jnp.abs(out - ref)))
    # bf16 operands with f32 accumulation across 4 fused matmuls vs f32 ref.
    assert err < 5e-2, f"max abs error vs reference: {err}"
    print("KERNEL_OK")
</pallas_src>

<mosaic_0001>
module attributes {stable_mosaic.version = 11 : i64} {
  func.func @_fused_forward_kernel(%arg0: i32, %arg1: memref<1x10x10x256xbf16, #tpu.memory_space<vmem>>, %arg2: memref<256x128xbf16, #tpu.memory_space<vmem>>, %arg3: memref<1x128xf32, #tpu.memory_space<vmem>>, %arg4: memref<1152x128xbf16, #tpu.memory_space<vmem>>, %arg5: memref<1x128xf32, #tpu.memory_space<vmem>>, %arg6: memref<1152x128xbf16, #tpu.memory_space<vmem>>, %arg7: memref<1x128xf32, #tpu.memory_space<vmem>>, %arg8: memref<128x128xbf16, #tpu.memory_space<vmem>>, %arg9: memref<1x128xf32, #tpu.memory_space<vmem>>, %arg10: memref<1x1x128xf32, #tpu.memory_space<vmem>>) attributes {dimension_semantics = [#tpu.dimension_semantics<parallel>], iteration_bounds = array<i64: 2>, scalar_prefetch = 0 : i64, scratch_operands = 0 : i64, tpu.core_type = #tpu.core_type<tc>, window_params = [{transform_indices = @transform_0, window_bounds = array<i64: 1, 10, 10, 256>}, {pipeline_mode = #tpu.pipeline_mode<synchronous>, transform_indices = @transform_1, window_bounds = array<i64: 256, 128>}, {pipeline_mode = #tpu.pipeline_mode<synchronous>, transform_indices = @transform_2, window_bounds = array<i64: 1, 128>}, {pipeline_mode = #tpu.pipeline_mode<synchronous>, transform_indices = @transform_3, window_bounds = array<i64: 1152, 128>}, {pipeline_mode = #tpu.pipeline_mode<synchronous>, transform_indices = @transform_4, window_bounds = array<i64: 1, 128>}, {pipeline_mode = #tpu.pipeline_mode<synchronous>, transform_indices = @transform_5, window_bounds = array<i64: 1152, 128>}, {pipeline_mode = #tpu.pipeline_mode<synchronous>, transform_indices = @transform_6, window_bounds = array<i64: 1, 128>}, {pipeline_mode = #tpu.pipeline_mode<synchronous>, transform_indices = @transform_7, window_bounds = array<i64: 128, 128>}, {pipeline_mode = #tpu.pipeline_mode<synchronous>, transform_indices = @transform_8, window_bounds = array<i64: 1, 128>}, {transform_indices = @transform_9, window_bounds = array<i64: 1, 1, 128>}]} {
    %c0 = arith.constant 0 : index
    %c0_0 = arith.constant 0 : index
    %c0_1 = arith.constant 0 : index
    %c0_2 = arith.constant 0 : index
    %0 = vector.load %arg1[%c0, %c0_0, %c0_1, %c0_2] : memref<1x10x10x256xbf16, #tpu.memory_space<vmem>>, vector<1x10x10x256xbf16>
    %1 = vector.shape_cast %0 : vector<1x10x10x256xbf16> to vector<10x10x256xbf16>
    %2 = vector.shape_cast %1 : vector<10x10x256xbf16> to vector<100x256xbf16>
    %c0_3 = arith.constant 0 : index
    %c0_4 = arith.constant 0 : index
    %3 = vector.load %arg2[%c0_3, %c0_4] : memref<256x128xbf16, #tpu.memory_space<vmem>>, vector<256x128xbf16>
    %cst = arith.constant dense<0.000000e+00> : vector<100x128xf32>
    %4 = tpu.matmul %2, %3, %cst {dimension_numbers = #tpu.dot_dimension_numbers<[1], [0], [0], [1], [0, 0, 1, 1], [], []>} : vector<100x256xbf16>, vector<256x128xbf16>, vector<100x128xf32> -> vector<100x128xf32>
    %c0_5 = arith.constant 0 : index
    %c0_6 = arith.constant 0 : index
    %5 = vector.load %arg3[%c0_5, %c0_6] : memref<1x128xf32, #tpu.memory_space<vmem>>, vector<1x128xf32>
    %6 = vector.broadcast %5 : vector<1x128xf32> to vector<100x128xf32>
    %7 = arith.addf %4, %6 : vector<100x128xf32>
    %cst_7 = arith.constant 0.000000e+00 : f32
    %8 = vector.broadcast %cst_7 : f32 to vector<100x128xf32>
    %9 = arith.maximumf %7, %8 : vector<100x128xf32>
    %10 = arith.truncf %9 : vector<100x128xf32> to vector<100x128xbf16>
    %11 = vector.shape_cast %10 : vector<100x128xbf16> to vector<10x10x128xbf16>
    %12 = vector.extract_strided_slice %11 {offsets = [0, 0, 0], sizes = [8, 8, 128], strides = [1, 1, 1]} : vector<10x10x128xbf16> to vector<8x8x128xbf16>
    %13 = vector.shape_cast %12 : vector<8x8x128xbf16> to vector<64x128xbf16>
    %14 = vector.extract_strided_slice %11 {offsets = [0, 1, 0], sizes = [8, 8, 128], strides = [1, 1, 1]} : vector<10x10x128xbf16> to vector<8x8x128xbf16>
    %15 = vector.shape_cast %14 : vector<8x8x128xbf16> to vector<64x128xbf16>
    %16 = vector.extract_strided_slice %11 {offsets = [0, 2, 0], sizes = [8, 8, 128], strides = [1, 1, 1]} : vector<10x10x128xbf16> to vector<8x8x128xbf16>
    %17 = vector.shape_cast %16 : vector<8x8x128xbf16> to vector<64x128xbf16>
    %18 = vector.extract_strided_slice %11 {offsets = [1, 0, 0], sizes = [8, 8, 128], strides = [1, 1, 1]} : vector<10x10x128xbf16> to vector<8x8x128xbf16>
    %19 = vector.shape_cast %18 : vector<8x8x128xbf16> to vector<64x128xbf16>
    %20 = vector.extract_strided_slice %11 {offsets = [1, 1, 0], sizes = [8, 8, 128], strides = [1, 1, 1]} : vector<10x10x128xbf16> to vector<8x8x128xbf16>
    %21 = vector.shape_cast %20 : vector<8x8x128xbf16> to vector<64x128xbf16>
    %22 = vector.extract_strided_slice %11 {offsets = [1, 2, 0], sizes = [8, 8, 128], strides = [1, 1, 1]} : vector<10x10x128xbf16> to vector<8x8x128xbf16>
    %23 = vector.shape_cast %22 : vector<8x8x128xbf16> to vector<64x128xbf16>
    %24 = vector.extract_strided_slice %11 {offsets = [2, 0, 0], sizes = [8, 8, 128], strides = [1, 1, 1]} : vector<10x10x128xbf16> to vector<8x8x128xbf16>
    %25 = vector.shape_cast %24 : vector<8x8x128xbf16> to vector<64x128xbf16>
    %26 = vector.extract_strided_slice %11 {offsets = [2, 1, 0], sizes = [8, 8, 128], strides = [1, 1, 1]} : vector<10x10x128xbf16> to vector<8x8x128xbf16>
    %27 = vector.shape_cast %26 : vector<8x8x128xbf16> to vector<64x128xbf16>
    %28 = vector.extract_strided_slice %11 {offsets = [2, 2, 0], sizes = [8, 8, 128], strides = [1, 1, 1]} : vector<10x10x128xbf16> to vector<8x8x128xbf16>
    %29 = vector.shape_cast %28 : vector<8x8x128xbf16> to vector<64x128xbf16>
    %30 = tpu.concatenate %13, %15, %17, %19, %21, %23, %25, %27, %29 in 1 : vector<64x128xbf16>, vector<64x128xbf16>, vector<64x128xbf16>, vector<64x128xbf16>, vector<64x128xbf16>, vector<64x128xbf16>, vector<64x128xbf16>, vector<64x128xbf16>, vector<64x128xbf16> -> vector<64x1152xbf16>
    %c0_8 = arith.constant 0 : index
    %c0_9 = arith.constant 0 : index
    %31 = vector.load %arg4[%c0_8, %c0_9] : memref<1152x128xbf16, #tpu.memory_space<vmem>>, vector<1152x128xbf16>
    %cst_10 = arith.constant dense<0.000000e+00> : vector<64x128xf32>
    %32 = tpu.matmul %30, %31, %cst_10 {dimension_numbers = #tpu.dot_dimension_numbers<[1], [0], [0], [1], [0, 0, 1, 1], [], []>} : vector<64x1152xbf16>, vector<1152x128xbf16>, vector<64x128xf32> -> vector<64x128xf32>
    %c0_11 = arith.constant 0 : index
    %c0_12 = arith.constant 0 : index
    %33 = vector.load %arg5[%c0_11, %c0_12] : memref<1x128xf32, #tpu.memory_space<vmem>>, vector<1x128xf32>
    %34 = vector.broadcast %33 : vector<1x128xf32> to vector<64x128xf32>
    %35 = arith.addf %32, %34 : vector<64x128xf32>
    %cst_13 = arith.constant 0.000000e+00 : f32
    %36 = vector.broadcast %cst_13 : f32 to vector<64x128xf32>
    %37 = arith.maximumf %35, %36 : vector<64x128xf32>
    %38 = vector.shape_cast %37 : vector<64x128xf32> to vector<8x8x128xf32>
    %39 = vector.shape_cast %38 : vector<8x8x128xf32> to vector<4x2x8x128xf32>
    %cst_14 = arith.constant dense<0xFF800000> : vector<4x8x128xf32>
    %40 = vector.multi_reduction <maximumf>, %39, %cst_14 [1] : vector<4x2x8x128xf32> to vector<4x8x128xf32>
    %41 = vector.shape_cast %40 : vector<4x8x128xf32> to vector<4x4x2x128xf32>
    %cst_15 = arith.constant dense<0xFF800000> : vector<4x4x128xf32>
    %42 = vector.multi_reduction <maximumf>, %41, %cst_15 [2] : vector<4x4x2x128xf32> to vector<4x4x128xf32>
    %43 = arith.truncf %42 : vector<4x4x128xf32> to vector<4x4x128xbf16>
    %44 = vector.extract_strided_slice %43 {offsets = [0, 0, 0], sizes = [2, 2, 128], strides = [1, 1, 1]} : vector<4x4x128xbf16> to vector<2x2x128xbf16>
    %45 = vector.shape_cast %44 : vector<2x2x128xbf16> to vector<4x128xbf16>
    %46 = vector.extract_strided_slice %43 {offsets = [0, 1, 0], sizes = [2, 2, 128], strides = [1, 1, 1]} : vector<4x4x128xbf16> to vector<2x2x128xbf16>
    %47 = vector.shape_cast %46 : vector<2x2x128xbf16> to vector<4x128xbf16>
    %48 = vector.extract_strided_slice %43 {offsets = [0, 2, 0], sizes = [2, 2, 128], strides = [1, 1, 1]} : vector<4x4x128xbf16> to vector<2x2x128xbf16>
    %49 = vector.shape_cast %48 : vector<2x2x128xbf16> to vector<4x128xbf16>
    %50 = vector.extract_strided_slice %43 {offsets = [1, 0, 0], sizes = [2, 2, 128], strides = [1, 1, 1]} : vector<4x4x128xbf16> to vector<2x2x128xbf16>
    %51 = vector.shape_cast %50 : vector<2x2x128xbf16> to vector<4x128xbf16>
    %52 = vector.extract_strided_slice %43 {offsets = [1, 1, 0], sizes = [2, 2, 128], strides = [1, 1, 1]} : vector<4x4x128xbf16> to vector<2x2x128xbf16>
    %53 = vector.shape_cast %52 : vector<2x2x128xbf16> to vector<4x128xbf16>
    %54 = vector.extract_strided_slice %43 {offsets = [1, 2, 0], sizes = [2, 2, 128], strides = [1, 1, 1]} : vector<4x4x128xbf16> to vector<2x2x128xbf16>
    %55 = vector.shape_cast %54 : vector<2x2x128xbf16> to vector<4x128xbf16>
    %56 = vector.extract_strided_slice %43 {offsets = [2, 0, 0], sizes = [2, 2, 128], strides = [1, 1, 1]} : vector<4x4x128xbf16> to vector<2x2x128xbf16>
    %57 = vector.shape_cast %56 : vector<2x2x128xbf16> to vector<4x128xbf16>
    %58 = vector.extract_strided_slice %43 {offsets = [2, 1, 0], sizes = [2, 2, 128], strides = [1, 1, 1]} : vector<4x4x128xbf16> to vector<2x2x128xbf16>
    %59 = vector.shape_cast %58 : vector<2x2x128xbf16> to vector<4x128xbf16>
    %60 = vector.extract_strided_slice %43 {offsets = [2, 2, 0], sizes = [2, 2, 128], strides = [1, 1, 1]} : vector<4x4x128xbf16> to vector<2x2x128xbf16>
    %61 = vector.shape_cast %60 : vector<2x2x128xbf16> to vector<4x128xbf16>
    %62 = tpu.concatenate %45, %47, %49, %51, %53, %55, %57, %59, %61 in 1 : vector<4x128xbf16>, vector<4x128xbf16>, vector<4x128xbf16>, vector<4x128xbf16>, vector<4x128xbf16>, vector<4x128xbf16>, vector<4x128xbf16>, vector<4x128xbf16>, vector<4x128xbf16> -> vector<4x1152xbf16>
    %c0_16 = arith.constant 0 : index
    %c0_17 = arith.constant 0 : index
    %63 = vector.load %arg6[%c0_16, %c0_17] : memref<1152x128xbf16, #tpu.memory_space<vmem>>, vector<1152x128xbf16>
    %cst_18 = arith.constant dense<0.000000e+00> : vector<4x128xf32>
    %64 = tpu.matmul %62, %63, %cst_18 {dimension_numbers = #tpu.dot_dimension_numbers<[1], [0], [0], [1], [0, 0, 1, 1], [], []>} : vector<4x1152xbf16>, vector<1152x128xbf16>, vector<4x128xf32> -> vector<4x128xf32>
    %c0_19 = arith.constant 0 : index
    %c0_20 = arith.constant 0 : index
    %65 = vector.load %arg7[%c0_19, %c0_20] : memref<1x128xf32, #tpu.memory_space<vmem>>, vector<1x128xf32>
    %66 = vector.broadcast %65 : vector<1x128xf32> to vector<4x128xf32>
    %67 = arith.addf %64, %66 : vector<4x128xf32>
    %cst_21 = arith.constant 0.000000e+00 : f32
    %68 = vector.broadcast %cst_21 : f32 to vector<4x128xf32>
    %69 = arith.maximumf %67, %68 : vector<4x128xf32>
    %70 = vector.shape_cast %69 : vector<4x128xf32> to vector<2x2x128xf32>
    %71 = vector.shape_cast %70 : vector<2x2x128xf32> to vector<1x2x2x128xf32>
    %cst_22 = arith.constant dense<0xFF800000> : vector<1x2x128xf32>
    %72 = vector.multi_reduction <maximumf>, %71, %cst_22 [1] : vector<1x2x2x128xf32> to vector<1x2x128xf32>
    %73 = vector.shape_cast %72 : vector<1x2x128xf32> to vector<1x1x2x128xf32>
    %cst_23 = arith.constant dense<0xFF800000> : vector<1x1x128xf32>
    %74 = vector.multi_reduction <maximumf>, %73, %cst_23 [2] : vector<1x1x2x128xf32> to vector<1x1x128xf32>
    %75 = vector.shape_cast %74 : vector<1x1x128xf32> to vector<1x128xf32>
    %cst_24 = arith.constant dense<0.000000e+00> : vector<128xf32>
    %76 = vector.multi_reduction <add>, %75, %cst_24 [0] : vector<1x128xf32> to vector<128xf32>
    %77 = vector.shape_cast %76 : vector<128xf32> to vector<1x128xf32>
    %cst_25 = arith.constant 1.000000e+00 : f32
    %78 = vector.broadcast %cst_25 : f32 to vector<1x128xf32>
    %79 = arith.mulf %77, %78 : vector<1x128xf32>
    %80 = arith.truncf %79 : vector<1x128xf32> to vector<1x128xbf16>
    %c0_26 = arith.constant 0 : index
    %c0_27 = arith.constant 0 : index
    %81 = vector.load %arg8[%c0_26, %c0_27] : memref<128x128xbf16, #tpu.memory_space<vmem>>, vector<128x128xbf16>
    %cst_28 = arith.constant dense<0.000000e+00> : vector<1x128xf32>
    %82 = tpu.matmul %80, %81, %cst_28 {dimension_numbers = #tpu.dot_dimension_numbers<[1], [0], [0], [1], [0, 0, 1, 1], [], []>} : vector<1x128xbf16>, vector<128x128xbf16>, vector<1x128xf32> -> vector<1x128xf32>
    %c0_29 = arith.constant 0 : index
    %c0_30 = arith.constant 0 : index
    %83 = vector.load %arg9[%c0_29, %c0_30] : memref<1x128xf32, #tpu.memory_space<vmem>>, vector<1x128xf32>
    %84 = arith.addf %82, %83 : vector<1x128xf32>
    %85 = vector.shape_cast %84 : vector<1x128xf32> to vector<1x1x128xf32>
    %c0_31 = arith.constant 0 : index
    %c0_32 = arith.constant 0 : index
    %c0_33 = arith.constant 0 : index
    %86 = vector.load %arg10[%c0_31, %c0_32, %c0_33] : memref<1x1x128xf32, #tpu.memory_space<vmem>>, vector<1x1x128xf32>
    tpu.vector_store %arg10[%c0_31, %c0_32, %c0_33], %85 {strides = array<i32>} : memref<1x1x128xf32, #tpu.memory_space<vmem>>, vector<1x1x128xf32>,
    return
  }
  func.func @transform_0(%arg0: i32) -> (i32, i32, i32, i32) {
    %c0_i32 = arith.constant 0 : i32
    %c0_i32_0 = arith.constant 0 : i32
    %c0_i32_1 = arith.constant 0 : i32
    %c0_i32_2 = arith.constant 0 : i32
    return %arg0, %c0_i32, %c0_i32_0, %c0_i32_1 : i32, i32, i32, i32
  }
  func.func @transform_1(%arg0: i32) -> (i32, i32) {
    %c0_i32 = arith.constant 0 : i32
    %c0_i32_0 = arith.constant 0 : i32
    %c0_i32_1 = arith.constant 0 : i32
    return %c0_i32, %c0_i32_0 : i32, i32
  }
  func.func @transform_2(%arg0: i32) -> (i32, i32) {
    %c0_i32 = arith.constant 0 : i32
    %c0_i32_0 = arith.constant 0 : i32
    %c0_i32_1 = arith.constant 0 : i32
    return %c0_i32, %c0_i32_0 : i32, i32
  }
  func.func @transform_3(%arg0: i32) -> (i32, i32) {
    %c0_i32 = arith.constant 0 : i32
    %c0_i32_0 = arith.constant 0 : i32
    %c0_i32_1 = arith.constant 0 : i32
    return %c0_i32, %c0_i32_0 : i32, i32
  }
  func.func @transform_4(%arg0: i32) -> (i32, i32) {
    %c0_i32 = arith.constant 0 : i32
    %c0_i32_0 = arith.constant 0 : i32
    %c0_i32_1 = arith.constant 0 : i32
    return %c0_i32, %c0_i32_0 : i32, i32
  }
  func.func @transform_5(%arg0: i32) -> (i32, i32) {
    %c0_i32 = arith.constant 0 : i32
    %c0_i32_0 = arith.constant 0 : i32
    %c0_i32_1 = arith.constant 0 : i32
    return %c0_i32, %c0_i32_0 : i32, i32
  }
  func.func @transform_6(%arg0: i32) -> (i32, i32) {
    %c0_i32 = arith.constant 0 : i32
    %c0_i32_0 = arith.constant 0 : i32
    %c0_i32_1 = arith.constant 0 : i32
    return %c0_i32, %c0_i32_0 : i32, i32
  }
  func.func @transform_7(%arg0: i32) -> (i32, i32) {
    %c0_i32 = arith.constant 0 : i32
    %c0_i32_0 = arith.constant 0 : i32
    %c0_i32_1 = arith.constant 0 : i32
    return %c0_i32, %c0_i32_0 : i32, i32
  }
  func.func @transform_8(%arg0: i32) -> (i32, i32) {
    %c0_i32 = arith.constant 0 : i32
    %c0_i32_0 = arith.constant 0 : i32
    %c0_i32_1 = arith.constant 0 : i32
    return %c0_i32, %c0_i32_0 : i32, i32
  }
  func.func @transform_9(%arg0: i32) -> (i32, i32, i32) {
    %c0_i32 = arith.constant 0 : i32
    %c0_i32_0 = arith.constant 0 : i32
    %c0_i32_1 = arith.constant 0 : i32
    return %arg0, %c0_i32, %c0_i32_0 : i32, i32, i32
  }
}

</mosaic_0001>

<bundles_post_ra>
// kernel: base_model_forward.1
= control target key start
LH: loop header
LB: loop body
LE: loop exit
PB: predicated region body
PF: predicated region fallthrough
CT: control target
= control target key end

     0   :  { %14 = vsyncpa [#allocation3], 0  ;;  %s7596_s0 = inlined_call_operand.vmem [shape: bf16[2,10,10,256], index: 0, kind: input, shape index: {}]   ;;  %s7597_s1 = inlined_call_operand.vmem [shape: bf16[256,128], index: 1, kind: input, shape index: {}]   ;;  %s7598_s2 = inlined_call_operand.vmem [shape: f32[1,128], index: 2, kind: input, shape index: {}]   ;;  %s7599_s3 = inlined_call_operand.vmem [shape: bf16[1152,128], index: 3, kind: input, shape index: {}]   ;;  %s7600_s4 = inlined_call_operand.vmem [shape: f32[1,128], index: 4, kind: input, shape index: {}]   ;;  %s7601_s5 = inlined_call_operand.vmem [shape: bf16[1152,128], index: 5, kind: input, shape index: {}]   ;;  %s7602_s6 = inlined_call_operand.vmem [shape: f32[1,128], index: 6, kind: input, shape index: {}]   ;;  %s7603_s7 = inlined_call_operand.vmem [shape: bf16[128,128], index: 7, kind: input, shape index: {}]   ;;  %s7604_s8 = inlined_call_operand.vmem [shape: f32[1,128], index: 8, kind: input, shape index: {}]   ;;  %s7605_s9 = inlined_call_operand.hbm [shape: f32[2,1,128], index: 9, kind: output, shape index: {}]  }
   0x1   :  { %16 = vsyncpa [#allocation3 + $0x1], 0  ;;  %s6058_s30 = smov 0   ;;  %s6060_s10 = smov 0  }
   0x2   :  { %s6062_s11 = smov 0   ;;  %s6064_s12 = smov 0  }
   0x3 LB: > { %s6079_s13 = sadd.s32 4294967295, %s6001_s12   ;;  %s5067_s14 = sadd.s32 4294967294, %s6001_s12   ;;  %s6001_s12 = sphi %s6064_s12, %s7615_s12   ;;  %s5997_s11 = sphi %s6062_s11, %s7614_s11   ;;  %s5993_s10 = sphi %s6060_s10, %s7613_s10   ;;  %s5989_s30 = sphi %s6058_s30, %s7612_s30  }
   0x4   : > { %s6083_s15 = sadd.s32 1, %s6001_s12   ;;  %s223_s16 = sadd.s32 1, %s5997_s11 }
   0x5   : > { %s220_s17 = ssub.s32 %s6001_s12, %s6083_s15  ;;  %p233_p0 = scmp.ne.s32.totalorder %s5997_s11, %s5993_s10 }
   0x6   : > { %p221_p1 = scmp.eq.s32.totalorder %s220_s17, 0  ;;  %p234_p2 = scmp.eq.s32.totalorder %s6079_s13, 1 }
   0x7   : > { %p239_p3 = scmp.ne.s32.totalorder %s5993_s10, %s5989_s30  ;;  %p240_p4 = scmp.eq.s32.totalorder %s5067_s14, 1 }
   0x8   : > { %s6094_s18 = scalar_select %p221_p1, %s5997_s11, %s223_s16  }
   0x9   : > { %p6096_p5 = por %p234_p2, %p233_p0  ;;  %p6100_p6 = por %p240_p4, %p239_p3 }
   0xa   : > { %p5070_p7 = scmp.ge.s32.totalorder %s6001_s12, 1  ;;  %p290_p8 = scmp.lt.s32.totalorder %s6001_s12, 3 }
   0xc   : > { %p291_p9 = pnand %p5070_p7, %p290_p8 }
   0xd   : > { %v5771_v0 = vld [vmem:[%s7597_s1 + $0x40] sm:$0xff] (!%p291_p9)   ;;  %v5773_v2 = vld [vmem:[%s7597_s1 + $0x48] sm:$0xff] (!%p291_p9)   ;;  %p325_p10 = scmp.lt.s32.totalorder (!%p291_p9), %s6079_s13, 1  ;;  %v5775_v4 = vld [vmem:[%s7597_s1 + $0x50] sm:$0xff] (!%p291_p9)   ;;  %v382_v9 = vlaneseq (!%p291_p9)  ;;  %v6003_v14 = vmov (!%p291_p9), 1966171168  }
   0xe   : > { %294 = sbr.rel (%p291_p9) target bundleno = 1205 (0x4b5), region = 56  ;;  %v5772_v1 = vld [vmem:[%s7597_s1] sm:$0xff] (!%p291_p9)   ;;  %5327 = vmatprep.subr.bf16.mxu0 (!%p291_p9), %v5771_v0  ;;  %v5774_v3 = vld [vmem:[%s7597_s1 + $0x8] sm:$0xff] (!%p291_p9)   ;;  %v5776_v5 = vld [vmem:[%s7597_s1 + $0x10] sm:$0xff] (!%p291_p9)   ;;  %v380_v15 = vunpack.c.l.s4 (!%p291_p9), %v6003_v14  ;;  %vm1750_vm0 = vsmask.f32 (!%p291_p9), 256 }
   0xf   : > { %5328 = vmatpush3.bf16.msra.mxu0 (!%p291_p9), %v5772_v1  ;;  %v5777_v6 = vld [vmem:[%s7597_s1 + $0x58] sm:$0xff] (!%p291_p9)   ;;  %v5779_v8 = vld [vmem:[%s7597_s1 + $0x60] sm:$0xff] (!%p291_p9)   ;;  %v5781_v11 = vld [vmem:[%s7597_s1 + $0x68] sm:$0xff] (!%p291_p9)   ;;  %v6148_v16 = vshrl.u32 (!%p291_p9), %v382_v9, 7  ;;  %vm1751_vm1 = vsmask.f32 (!%p291_p9), 1284 }
  0x10   : > { %5329 = vmatprep.subr.bf16.mxu0 (!%p291_p9), %v5773_v2  ;;  %v5778_v7 = vld [vmem:[%s7597_s1 + $0x18] sm:$0xff] (!%p291_p9)   ;;  %v5780_v10 = vld [vmem:[%s7597_s1 + $0x20] sm:$0xff] (!%p291_p9)   ;;  %v5782_v17 = vld [vmem:[%s7597_s1 + $0x28] sm:$0xff] (!%p291_p9)   ;;  %v381_v22 = vunpack.c.0.s8 (!%p291_p9), %v380_v15  ;;  %vm1753_vm3 = vsmask.f32 (!%p291_p9), 2312  ;;  %vm3877_vm15 = vcmask (!%p291_p9), 1041408  }
  0x11   : > { %v5783_v18 = vld [vmem:[%s7597_s1 + $0x70] sm:$0xff] (!%p291_p9)   ;;  %v5785_v30 = vld [vmem:[%s7597_s1 + $0x78] sm:$0xff] (!%p291_p9)   ;;  %vm1752_vm2 = vmor (!%p291_p9), %vm1750_vm0, %vm1751_vm1  ;;  %vm1755_vm5 = vsmask.f32 (!%p291_p9), 3340  ;;  %vm1757_vm7 = vsmask.f32 (!%p291_p9), 4368 }
  0x12   : > { %v6160_v26 = vsub.s32 (!%p291_p9), %v381_v22, %v6148_v16  ;;  %v5784_v29 = vld [vmem:[%s7597_s1 + $0x30] sm:$0xff] (!%p291_p9)   ;;  %v5786_v46 = vld [vmem:[%s7597_s1 + $0x38] sm:$0xff] (!%p291_p9)   ;;  %vm1754_vm4 = vmor (!%p291_p9), %vm1752_vm2, %vm1753_vm3  ;;  %vm1759_vm9 = vsmask.f32 (!%p291_p9), 5396  ;;  %vm1761_vm11 = vsmask.f32 (!%p291_p9), 6424 }
  0x13   : > { %5330 = vmatpush3.bf16.msra.mxu0 (!%p291_p9), %v5774_v3  ;;  %vm1756_vm6 = vmor (!%p291_p9), %vm1754_vm4, %vm1755_vm5  ;;  %vm1763_vm13 = vsmask.f32 (!%p291_p9), 7452  ;;  %vm4014_vm0 = vcmask (!%p291_p9), 1041409   ;;  %vm4016_vm1 = vcmask (!%p291_p9), 1042434   ;;  %vm4018_vm2 = vcmask (!%p291_p9), 1043459   ;;  %s323_s21 = sand.u32 (!%p291_p9), 1, %s5993_s10  }
  0x14   : > { %5331 = vmatprep.subr.bf16.mxu0 (!%p291_p9), %v5775_v4  ;;  %vm1758_vm8 = vmor (!%p291_p9), %vm1756_vm6, %vm1757_vm7  ;;  %vm6006_vm3 = vmmov (!%p291_p9), 0   ;;  %s5324_s23 = sshll.u32 (!%p291_p9), %s6079_s13, 4  ;;  %s5000_s29 = scalar_lea.sflag (!%p291_p9), [#allocation3], %s323_s21 }
  0x15   : > { %s326_s16 = scalar_select %p325_p10, %s6079_s13, 1  ;;  %vm1760_vm10 = vmor %vm1758_vm8, %vm1759_vm9 }
  0x16   : > { %vm6407_vm12 = vmor %vm1760_vm10, %vm1761_vm11  ;;  %s7554_s28 = scalar_lea.hbm %s7605_s9, %s5324_s23  ;;  %s6007_s14 = smov [#allocation2]  }
  0x17   : > { %s5727_s24 = smul.u32 160, %s326_s16  ;;  %5332 = vmatpush3.bf16.msra.mxu0 %v5776_v5  ;;  %vm6426_vm14 = vmor %vm6407_vm12, %vm1763_vm13  ;;  %s5943_s16 = sshll.u32 %s6007_s14, 4  ;;  %s5944_s16 = int_to_ptr.vmem [resolvable:$false] %s5943_s16 }
  0x18   : > { %5333 = vmatprep.subr.bf16.mxu0 %v5777_v6  ;;  %s5945_s22 = scalar_lea.vmem %s5944_s16, 32 }
  0x19   : > { %s6138_s17 = scalar_lea.vmem %s7596_s0, %s5727_s24  ;;  %s324_s24 = scalar_lea.vmem [#allocation2], %s323_s21 }
  0x1a   : > { %v5072_v12 = vld.sshfl [vmem:[%s6138_s17] sm:$0xff pattern:$0x75316420]  ;;  %v5074_v13 = vld.sshfl [vmem:[%s6138_s17 + $0x10] sm:$0xff pattern:$0x75316420] }
  0x1b   : > { %5334 = vmatpush3.bf16.msra.mxu0 %v5778_v7  ;;  %v5076_v19 = vld.sshfl [vmem:[%s6138_s17 + $0x20] sm:$0xff pattern:$0x75316420]  ;;  %v378_v21 = vcombine.high %v5072_v12, %v5072_v12  ;;  %v416_v23 = vcombine.high %v5074_v13, %v5074_v13  ;;  %v5078_v27 = vld.sshfl [vmem:[%s6138_s17 + $0x30] sm:$0xff pattern:$0x75316420]  ;;  %v385_v33 = vrot.slane %v5072_v12, %v6160_v26  ;;  %v423_v36 = vrot.slane %v5074_v13, %v6160_v26 }
  0x1c   : > { %5335 = vmatprep.subr.bf16.mxu0 %v5779_v8  ;;  %v5073_v20 = vld.sshfl [vmem:[%s6138_s17 + $0x8] sm:$0x5 pattern:$0x75316420]  ;;  %v454_v25 = vcombine.high %v5076_v19, %v5076_v19  ;;  %v492_v31 = vcombine.high %v5078_v27, %v5078_v27  ;;  %v461_v40 = vrot.slane %v5076_v19, %v6160_v26  ;;  %v499_v49 = vrot.slane %v5078_v27, %v6160_v26  ;;  %s5012_s25 = sshll.u32 %s324_s24, 4  ;;  %s7556_s25 = int_to_ptr.vmem [resolvable:$true] %s5012_s25 }
  0x1d   : > { %v5075_v24 = vld.sshfl [vmem:[%s6138_s17 + $0x18] sm:$0x5 pattern:$0x75316420]  ;;  %v392_v34 = vrot.slane %v378_v21, %v6160_v26  ;;  %v408_v35 = vrot.slane %v5073_v20, %v6160_v26  ;;  %v430_v38 = vrot.slane %v416_v23, %v6160_v26  ;;  %v431_v42 = vcombine.high %v423_v36, %v423_v36  ;;  %s5939_s13 = scalar_lea.vmem %s7556_s25, 16  ;;  %p5946_p0 = scmp.lt.s32.totalorder %s7556_s25, %s5944_s16 }
  0x1e   : > { %v6164_v28 = vld.sshfl [vmem:[%s6138_s17 + $0x40] sm:$0xff pattern:$0x75316420]  ;;  %v446_v39 = vrot.slane %v5075_v24, %v6160_v26  ;;  %v468_v41 = vrot.slane %v454_v25, %v6160_v26  ;;  %v506_v63 = vrot.slane %v492_v31, %v6160_v26  ;;  %v5082_v0 = vld.sshfl [vmem:[%s6138_s17 + $0x50] sm:$0xff pattern:$0x75316420]  ;;  %v507_v4 = vcombine.high %v499_v49, %v499_v49  ;;  %p5940_p11 = scmp.ne.s32.totalorder %s7556_s25, %s5939_s13  ;;  %p5947_p1 = scmp.lt.s32.totalorder %s5945_s22, %s5939_s13 }
  0x1f   : > { %5336 = vmatpush3.bf16.msra.mxu0 %v5780_v10  ;;  %v530_v32 = vcombine.high %v6164_v28, %v6164_v28  ;;  %v5077_v37 = vld.sshfl [vmem:[%s6138_s17 + $0x28] sm:$0x5 pattern:$0x75316420]  ;;  %v790_v43 = vcombine.low %v385_v33, %v392_v34  ;;  %v5093_v44 = vcombine.high %v385_v33, %v392_v34  ;;  %v792_v45 = vcombine.low %v408_v35, %v423_v36 }
  0x20   : > { %5337 = vmatprep.subr.bf16.mxu0 %v5781_v11  ;;  %v432_v47 = vcombine.high %v430_v38, %v430_v38  ;;  %v484_v48 = vrot.slane %v5077_v37, %v6160_v26  ;;  %v857_v50 = vcombine.low %v461_v40, %v468_v41  ;;  %v793_v51 = vcombine.low %v430_v38, %v431_v42  ;;  %v5079_v59 = vld.sshfl [vmem:[%s6138_s17 + $0x38] sm:$0x5 pattern:$0x75316420]  ;;  %p5941_p12 = pnand %p5940_p11, %p6096_p5  ;;  %p5948_p2 = por %p5947_p1, %p5946_p0 }
  0x21   : > { %v800_v52 = vrot.slane %v790_v43, %v6160_v26  ;;  %v807_v53 = vrot.slane %v5093_v44, %v6160_v26  ;;  %v814_v54 = vrot.slane %v792_v45, %v6160_v26  ;;  %v5094_v56 = vcombine.high %v461_v40, %v468_v41  ;;  %v5081_v13 = vld.sshfl [vmem:[%s6138_s17 + $0x48] sm:$0x5 pattern:$0x75316420] }
  0x22   : > { %v856_v55 = vcombine.low %v432_v47, %v446_v39  ;;  %v859_v57 = vcombine.low %v484_v48, %v499_v49  ;;  %v873_v58 = vrot.slane %v857_v50, %v6160_v26  ;;  %v821_v60 = vrot.slane %v793_v51, %v6160_v26  ;;  %v5083_v19 = vld.sshfl [vmem:[%s6138_s17 + $0x58] sm:$0x5 pattern:$0x75316420]  ;;  %p5942_p13 = pneg %p5941_p12 }
  0x23   : > { %5338 = vmatpush3.bf16.msra.mxu0 %v5782_v17  ;;  %v823_v61 = vcombine.high %v800_v52, %v807_v53  ;;  %v822_v62 = vcombine.low %v800_v52, %v807_v53  ;;  %v880_v2 = vrot.slane %v5094_v56, %v6160_v26  ;;  %v508_v17 = vcombine.high %v506_v63, %v506_v63  ;;  %v5084_v23 = vld.sshfl [vmem:[%s6138_s17 + $0x60] sm:$0xff pattern:$0x75316420]  ;;  %v5086_v47 = vld.sshfl [vmem:[%s6138_s17 + $0x70] sm:$0xff pattern:$0x75316420] }
  0x24   : > { %5339 = vmatprep.subr.bf16.mxu0 %v5783_v18  ;;  %v866_v1 = vrot.slane %v856_v55, %v6160_v26  ;;  %v887_v3 = vrot.slane %v859_v57, %v6160_v26  ;;  %v825_v5 = vcombine.high %v814_v54, %v821_v60  ;;  %v824_v7 = vcombine.low %v814_v54, %v821_v60  ;;  %v5087_v56 = vld.sshfl [vmem:[%s6138_s17 + $0x78] sm:$0x5 pattern:$0x75316420]  ;;  %p5949_p3 = pnand %p5948_p2, %p5942_p13 }
  0x25   : > { %v839_v6 = vrot.slane %v823_v61, %v6160_v26  ;;  %v832_v8 = vrot.slane %v822_v62, %v6160_v26  ;;  %v522_v18 = vrot.slane %v5079_v59, %v6160_v26  ;;  %v568_v24 = vcombine.high %v5082_v0, %v5082_v0 }
  0x26   : > { %v889_v9 = vcombine.high %v866_v1, %v873_v58  ;;  %v891_v10 = vcombine.high %v880_v2, %v887_v3  ;;  %v888_v11 = vcombine.low %v866_v1, %v873_v58  ;;  %v890_v12 = vcombine.low %v880_v2, %v887_v3 }
  0x27   : > { %5340 = vmatpush3.bf16.msra.mxu0 %v5784_v29  ;;  %v853_v14 = vrot.slane %v825_v5, %v6160_v26  ;;  %v846_v15 = vrot.slane %v824_v7, %v6160_v26  ;;  %v537_v29 = vrot.slane %v6164_v28, %v6160_v26  ;;  %v922_v34 = vcombine.low %v506_v63, %v507_v4 }
  0x28   : > { %5341 = vmatprep.subr.bf16.mxu0 %v5785_v30  ;;  %v905_v20 = vrot.slane %v889_v9, %v6160_v26  ;;  %v919_v21 = vrot.slane %v891_v10, %v6160_v26  ;;  %v898_v22 = vrot.slane %v888_v11, %v6160_v26  ;;  %v544_v30 = vrot.slane %v530_v32, %v6160_v26 }
  0x29   : > { %v855_v25 = vcombine.low %v839_v6, %v853_v14  ;;  %v854_v27 = vcombine.low %v832_v8, %v846_v15  ;;  %v912_v33 = vrot.slane %v890_v12, %v6160_v26  ;;  %v923_v35 = vcombine.low %v508_v17, %v522_v18  ;;  %v5088_v8 = vld.sshfl [vmem:[%s6138_s17 + $0x80] sm:$0xff pattern:$0x75316420] }
  0x2a   : > { %v921_v31 = vcombine.low %v905_v20, %v919_v21  ;;  %v924_v36 = vcombine.low %v537_v29, %v544_v30  ;;  %v5095_v37 = vcombine.high %v537_v29, %v544_v30  ;;  %v560_v38 = vrot.slane %v5081_v13, %v6160_v26  ;;  %v5089_v17 = vld.sshfl [vmem:[%s6138_s17 + $0x88] sm:$0x5 pattern:$0x75316420] }
  0x2b   : > { %5342 = vmatpush3.bf16.msra.mxu0 %v5786_v46  ;;  %1351 = vmatprep.mubr.bf16.mxu0 %v855_v25  ;;  %v575_v39 = vrot.slane %v5082_v0, %v6160_v26  ;;  %v932_v40 = vrot.slane %v922_v34, %v6160_v26  ;;  %v939_v28 = vrot.slane %v923_v35, %v6160_v26  ;;  %v5085_v46 = vld.sshfl [vmem:[%s6138_s17 + $0x68] sm:$0x5 pattern:$0x75316420] }
  0x2c   : > { %v582_v32 = vrot.slane %v568_v24, %v6160_v26  ;;  %v598_v41 = vrot.slane %v5083_v19, %v6160_v26  ;;  %v946_v42 = vrot.slane %v924_v36, %v6160_v26  ;;  %v953_v43 = vrot.slane %v5095_v37, %v6160_v26 }
  0x2d   : > { %v583_v44 = vcombine.high %v575_v39, %v575_v39  ;;  %v606_v45 = vcombine.high %v5084_v23, %v5084_v23  ;;  %v920_v48 = vcombine.low %v898_v22, %v912_v33  ;;  %v955_v49 = vcombine.high %v932_v40, %v939_v28  ;;  %v5090_v22 = vld.sshfl [vmem:[%s6138_s17 + $0x90] sm:$0xff pattern:$0x75316420] }
  0x2e   : > { %1352 = vmatmul.mubr.bf16.vlgmr.msra.gmra.mrb[0].mxu0 %v854_v27  ;;  %v584_v50 = vcombine.high %v582_v32, %v582_v32  ;;  %v613_v51 = vrot.slane %v5084_v23, %v6160_v26  ;;  %v957_v52 = vcombine.high %v946_v42, %v953_v43  ;;  %v954_v53 = vcombine.low %v932_v40, %v939_v28 }
  0x2f   : > { %1359 = vmatprep.mubr.bf16.mxu0 %v921_v31  ;;  %v620_v54 = vrot.slane %v606_v45, %v6160_v26  ;;  %v988_v55 = vcombine.low %v560_v38, %v575_v39  ;;  %v971_v57 = vrot.slane %v955_v49, %v6160_v26  ;;  %v956_v58 = vcombine.low %v946_v42, %v953_v43  ;;  %v5091_v43 = vld.sshfl [vmem:[%s6138_s17 + $0x98] sm:$0x5 pattern:$0x75316420] }
  0x30   : > { %v989_v59 = vcombine.low %v582_v32, %v583_v44  ;;  %v990_v60 = vcombine.low %v584_v50, %v598_v41  ;;  %v985_v61 = vrot.slane %v957_v52, %v6160_v26  ;;  %v636_v2 = vrot.slane %v5085_v46, %v6160_v26 }
  0x31   : > { %v991_v62 = vcombine.low %v613_v51, %v620_v54  ;;  %v998_v63 = vrot.slane %v988_v55, %v6160_v26  ;;  %v644_v3 = vcombine.high %v5086_v47, %v5086_v47  ;;  %v964_v5 = vrot.slane %v954_v53, %v6160_v26 }
  0x32   : > { %v1005_v0 = vrot.slane %v989_v59, %v6160_v26  ;;  %v1012_v1 = vrot.slane %v990_v60, %v6160_v26  ;;  %v987_v4 = vcombine.low %v971_v57, %v985_v61  ;;  %v651_v7 = vrot.slane %v5086_v47, %v6160_v26 }
  0x33   : > { %v1019_v6 = vrot.slane %v991_v62, %v6160_v26  ;;  %v978_v9 = vrot.slane %v956_v58, %v6160_v26  ;;  %v658_v11 = vrot.slane %v644_v3, %v6160_v26  ;;  %v674_v12 = vrot.slane %v5087_v56, %v6160_v26 }
  0x34   : > { %v1021_v10 = vcombine.high %v998_v63, %v1005_v0  ;;  %v659_v14 = vcombine.high %v651_v7, %v651_v7  ;;  %v5096_v15 = vcombine.high %v613_v51, %v620_v54  ;;  %v1020_v19 = vcombine.low %v998_v63, %v1005_v0 }
  0x35   : > { %v1023_v13 = vcombine.high %v1012_v1, %v1019_v6  ;;  %v660_v20 = vcombine.high %v658_v11, %v658_v11  ;;  %v1055_v21 = vcombine.low %v636_v2, %v651_v7  ;;  %v1022_v24 = vcombine.low %v1012_v1, %v1019_v6 }
  0x36   : > { %1360 = vmatmul.mubr.bf16.gmra.mrb[4].mxu0 %v920_v48  ;;  %v1037_v18 = vrot.slane %v1021_v10, %v6160_v26  ;;  %v1056_v25 = vcombine.low %v658_v11, %v659_v14  ;;  %v1064_v27 = vrot.slane %v5096_v15, %v6160_v26  ;;  %v986_v29 = vcombine.low %v964_v5, %v978_v9 }
  0x37   : > { %1367 = vmatprep.mubr.bf16.mxu0 %v987_v4  ;;  %v1051_v23 = vrot.slane %v1023_v13, %v6160_v26  ;;  %v1057_v30 = vcombine.low %v660_v20, %v674_v12  ;;  %v1071_v31 = vrot.slane %v1055_v21, %v6160_v26  ;;  %v682_v33 = vcombine.high %v5088_v8, %v5088_v8  ;;  %v5789_v20 = vld [vmem:[%s7599_s3 + $0x140] sm:$0xff]  }
  0x38   : > { %v1078_v35 = vrot.slane %v1056_v25, %v6160_v26  ;;  %v689_v36 = vrot.slane %v5088_v8, %v6160_v26  ;;  %v712_v40 = vrot.slane %v5089_v17, %v6160_v26  ;;  %v1030_v28 = vrot.slane %v1020_v19, %v6160_v26  ;;  %v5788_v19 = vld [vmem:[%s7599_s3] sm:$0xff]   ;;  %5465 = vmatprep.subr.bf16.mxu0 %v5789_v20  ;;  %v5794_v25 = vld [vmem:[%s7599_s3 + $0x108] sm:$0xff]  }
  0x39   : > { %v1053_v34 = vcombine.low %v1037_v18, %v1051_v23  ;;  %v1085_v37 = vrot.slane %v1057_v30, %v6160_v26  ;;  %v1087_v38 = vcombine.high %v1064_v27, %v1071_v31  ;;  %v696_v39 = vrot.slane %v682_v33, %v6160_v26  ;;  %v5787_v18 = vld [vmem:[%s7599_s3 + $0x40] sm:$0xff]   ;;  %v5792_v23 = vld [vmem:[%s7599_s3 + $0x8] sm:$0xff]   ;;  %v5797_v30 = vld [vmem:[%s7599_s3 + $0x150] sm:$0xff]  }
  0x3a   : > { %v1044_v32 = vrot.slane %v1022_v24, %v6160_v26  ;;  %v720_v41 = vcombine.high %v5090_v22, %v5090_v22  ;;  %v727_v42 = vrot.slane %v5090_v22, %v6160_v26  ;;  %v1086_v56 = vcombine.low %v1064_v27, %v1071_v31  ;;  %5385 = vmatprep.subr.bf16.mxu1 %v5787_v18  ;;  %v5790_v21 = vld [vmem:[%s7599_s3 + $0x100] sm:$0xff]   ;;  %v5791_v22 = vld [vmem:[%s7599_s3 + $0x48] sm:$0xff]   ;;  %v5795_v27 = vld [vmem:[%s7599_s3 + $0x50] sm:$0xff]  }
  0x3b   : > { %v1089_v44 = vcombine.high %v1078_v35, %v1085_v37  ;;  %v1103_v45 = vrot.slane %v1087_v38, %v6160_v26  ;;  %v1120_v48 = vcombine.low %v689_v36, %v696_v39  ;;  %v5097_v49 = vcombine.high %v689_v36, %v696_v39  ;;  %5386 = vmatpush3.bf16.msra.mxu1 %v5788_v19  ;;  %v5793_v24 = vld [vmem:[%s7599_s3 + $0x148] sm:$0xff]   ;;  %v5798_v31 = vld [vmem:[%s7599_s3 + $0x110] sm:$0xff]   ;;  %v5799_v33 = vld [vmem:[%s7599_s3 + $0x58] sm:$0xff]  }
  0x3c   : > { %v734_v46 = vrot.slane %v720_v41, %v6160_v26  ;;  %v735_v47 = vcombine.high %v727_v42, %v727_v42  ;;  %v1122_v51 = vcombine.low %v712_v40, %v727_v42  ;;  %v1052_v52 = vcombine.low %v1030_v28, %v1044_v32  ;;  %5466 = vmatpush3.bf16.msra.mxu0 %v5790_v21  ;;  %v5802_v36 = vld [vmem:[%s7599_s3 + $0x118] sm:$0xff]   ;;  %v5804_v38 = vld [vmem:[%s7599_s3 + $0x20] sm:$0xff]   ;;  %v5807_v28 = vld [vmem:[%s7599_s3 + $0x68] sm:$0xff]  }
  0x3d   : > { %v1117_v50 = vrot.slane %v1089_v44, %v6160_v26  ;;  %v1130_v54 = vrot.slane %v1120_v48, %v6160_v26  ;;  %v1137_v55 = vrot.slane %v5097_v49, %v6160_v26  ;;  %v1088_v57 = vcombine.low %v1078_v35, %v1085_v37  ;;  %5387 = vmatprep.subr.bf16.mxu1 %v5791_v22  ;;  %v5801_v35 = vld [vmem:[%s7599_s3 + $0x158] sm:$0xff]   ;;  %v5803_v37 = vld [vmem:[%s7599_s3 + $0x60] sm:$0xff]   ;;  %v5808_v32 = vld [vmem:[%s7599_s3 + $0x28] sm:$0xff]  }
  0x3e   : > { %1368 = vmatmul.mubr.bf16.gmra.mrb[8].mxu0 %v986_v29  ;;  %v1123_v53 = vcombine.low %v734_v46, %v735_v47  ;;  %v1144_v58 = vrot.slane %v1122_v51, %v6160_v26  ;;  %v750_v59 = vrot.slane %v5091_v43, %v6160_v26  ;;  %v736_v63 = vcombine.high %v734_v46, %v734_v46  ;;  %v5796_v29 = vld [vmem:[%s7599_s3 + $0x10] sm:$0xff]   ;;  %v5805_v39 = vld [vmem:[%s7599_s3 + $0x160] sm:$0xff]   ;;  %v5809_v41 = vld [vmem:[%s7599_s3 + $0x168] sm:$0xff]  }
  0x3f   : > { %1375 = vmatprep.mubr.bf16.mxu0 %v1053_v34  ;;  %v1119_v60 = vcombine.low %v1103_v45, %v1117_v50  ;;  %v1153_v62 = vcombine.high %v1130_v54, %v1137_v55  ;;  %v1096_v1 = vrot.slane %v1086_v56, %v6160_v26  ;;  %v1110_v2 = vrot.slane %v1088_v57, %v6160_v26  ;;  %v5800_v34 = vld [vmem:[%s7599_s3 + $0x18] sm:$0xff]   ;;  %v5806_v40 = vld [vmem:[%s7599_s3 + $0x120] sm:$0xff]   ;;  %v5810_v42 = vld [vmem:[%s7599_s3 + $0x128] sm:$0xff]  }
  0x40   : > { %v1151_v61 = vrot.slane %v1123_v53, %v6160_v26  ;;  %v1186_v5 = vcombine.low %v736_v63, %v750_v59  ;;  %v1152_v7 = vcombine.low %v1130_v54, %v1137_v55  ;;  %5388 = vmatpush3.bf16.msra.mxu1 %v5792_v23  ;;  %5467 = vmatprep.subr.bf16.mxu0 %v5793_v24  ;;  %v5811_v43 = vld [vmem:[%s7599_s3 + $0x70] sm:$0xff]   ;;  %v5815_v47 = vld [vmem:[%s7599_s3 + $0x78] sm:$0xff]   ;;  %v5819_v51 = vld [vmem:[%s7599_s3 + $0xc0] sm:$0xff]  }
  0x41   : > { %v1169_v3 = vrot.slane %v1153_v62, %v6160_v26  ;;  %v1118_v6 = vcombine.low %v1096_v1, %v1110_v2  ;;  %5468 = vmatpush3.bf16.msra.mxu0 %v5794_v25  ;;  %5389 = vmatprep.subr.bf16.mxu1 %v5795_v27  ;;  %v5812_v44 = vld [vmem:[%s7599_s3 + $0x30] sm:$0xff]   ;;  %v5816_v48 = vld [vmem:[%s7599_s3 + $0x38] sm:$0xff]   ;;  %v6383_v54 = vld [vmem:[%s7598_s2] ss:$0 sm:$0xff] }
  0x42   : > { %v1155_v0 = vcombine.high %v1144_v58, %v1151_v61  ;;  %v1154_v8 = vcombine.low %v1144_v58, %v1151_v61  ;;  %v1193_v10 = vrot.slane %v1186_v5, %v6160_v26  ;;  %v1162_v11 = vrot.slane %v1152_v7, %v6160_v26  ;;  %5469 = vmatprep.subr.bf16.mxu0 %v5797_v30  ;;  %v5813_v45 = vld [vmem:[%s7599_s3 + $0x170] sm:$0xff]   ;;  %v5817_v49 = vld [vmem:[%s7599_s3 + $0x178] sm:$0xff]  }
  0x43   : > { %v5814_v46 = vld [vmem:[%s7599_s3 + $0x130] sm:$0xff]   ;;  %v5818_v50 = vld [vmem:[%s7599_s3 + $0x138] sm:$0xff]  }
  0x44   : > { %v1183_v4 = vrot.slane %v1155_v0, %v6160_v26  ;;  %v1176_v12 = vrot.slane %v1154_v8, %v6160_v26  ;;  %v1194_v13 = vcombine.high %v1193_v10, %v1193_v10  ;;  %v1201_v17 = vrot.slane %v1193_v10, %v6160_v26  ;;  %5390 = vmatpush3.bf16.msra.mxu1 %v5796_v29 }
  0x45   : > { %5470 = vmatpush3.bf16.msra.mxu0 %v5798_v31  ;;  %5391 = vmatprep.subr.bf16.mxu1 %v5799_v33 }
  0x46   : > { %1376 = vmatmul.mubr.bf16.gmra.mrb[12].mxu0 %v1052_v52  ;;  %v1185_v9 = vcombine.low %v1169_v3, %v1183_v4  ;;  %v1184_v14 = vcombine.low %v1162_v11, %v1176_v12  ;;  %v1208_v15 = vrot.slane %v1194_v13, %v6160_v26  ;;  %5471 = vmatprep.subr.bf16.mxu0 %v5801_v35  ;;  %v6377_v52 = vld [vmem:[%s7599_s3 + $0x200] sm:$0xff]  }
  0x47   : > { %1383 = vmatprep.mubr.bf16.mxu0 %v1119_v60 }
  0x48   : > { %5392 = vmatpush3.bf16.msra.mxu1 %v5800_v34 }
  0x49   : > { %5472 = vmatpush3.bf16.msra.mxu0 %v5802_v36  ;;  %5393 = vmatprep.subr.bf16.mxu1 %v5803_v37 }
  0x4a   : > { %5473 = vmatprep.subr.bf16.mxu0 %v5805_v39 }
  0x4c   : > { %5394 = vmatpush3.bf16.msra.mxu1 %v5804_v38 }
  0x4d   : > { %5474 = vmatpush3.bf16.msra.mxu0 %v5806_v40  ;;  %5395 = vmatprep.subr.bf16.mxu1 %v5807_v28 }
  0x4e   : > { %1384 = vmatmul.mubr.bf16.gmra.mrb[16].mxu0 %v1118_v6  ;;  %5475 = vmatprep.subr.bf16.mxu0 %v5809_v41 }
  0x4f   : > { %1391 = vmatprep.mubr.bf16.mxu0 %v1185_v9 }
  0x50   : > { %5396 = vmatpush3.bf16.msra.mxu1 %v5808_v32 }
  0x51   : > { %5476 = vmatpush3.bf16.msra.mxu0 %v5810_v42  ;;  %5397 = vmatprep.subr.bf16.mxu1 %v5811_v43 }
  0x52   : > { %5477 = vmatprep.subr.bf16.mxu0 %v5813_v45 }
  0x54   : > { %5398 = vmatpush3.bf16.msra.mxu1 %v5812_v44 }
  0x55   : > { %5478 = vmatpush3.bf16.msra.mxu0 %v5814_v46  ;;  %5399 = vmatprep.subr.bf16.mxu1 %v5815_v47 }
  0x56   : > { %1392 = vmatmul.mubr.bf16.gmra.mrb[20].mxu0 %v1184_v14  ;;  %5479 = vmatprep.subr.bf16.mxu0 %v5817_v49 }
  0x57   : > { %1399 = vmatprep.mubr.bf16.mxu0 %v1208_v15 }
  0x58   : > { %5400 = vmatpush3.bf16.msra.mxu1 %v5816_v48 }
  0x59   : > { %5480 = vmatpush3.bf16.msra.mxu0 %v5818_v50  ;;  %5425 = vmatprep.subr.bf16.mxu1 %v5819_v51 }
  0x5a   : > { %5663 = vmatprep.subr.bf16.mxu0 %v6377_v52 }
  0x5e   : > { %1400 = vmatmul.mubr.bf16.gmra.mrb[24].mxu0 %v1201_v17 }
 0x101   : > { %v5343_v53 = vpop.f32.mrb[0].mxu0 }
 0x102   : > { %v5344_v55 = vpop.f32.mrb[1].mxu0 }
 0x103   : > { %v5345_v56 = vadd.f32 %v5344_v55, %v5343_v53  ;;  %v5346_v57 = vpop.f32.mrb[2].mxu0 }
 0x104   : > { %v5347_v58 = vpop.f32.mrb[3].mxu0 }
 0x105   : > { %v1354_v59 = vadd.f32 %v5345_v56, %v6383_v54  ;;  %v5348_v60 = vadd.f32 %v5347_v58, %v5346_v57 }
 0x107   : > { %v1357_v61 = vadd.f32 %v5348_v60, %v6383_v54  ;;  %v1407_v62 = vmax.f32 %v1354_v59, 0.0 }
 0x109   : > { %v1408_v63 = vmax.f32 %v1357_v61, 0.0  ;;  %v5349_v0 = vpop.f32.mrb[4].mxu0 }
 0x10a   : > { %v5350_v1 = vpop.f32.mrb[5].mxu0 }
 0x10b   : > { %v1420_v2 = vpack.c.bf16 %v1408_v63, %v1407_v62  ;;  %v5114_v3 = vpack.c.bf16 %v1408_v63, %v1408_v63  ;;  %v5351_v4 = vadd.f32 %v5350_v1, %v5349_v0  ;;  %v5352_v5 = vpop.f32.mrb[6].mxu0 }
 0x10c   : > { %v5353_v6 = vpop.f32.mrb[7].mxu0 }
 0x10d   : > { %v1441_v7 = vrot.slane %v1420_v2, %v6160_v26  ;;  %v1448_v8 = vrot.slane %v5114_v3, %v6160_v26  ;;  %v5354_v9 = vadd.f32 %v5353_v6, %v5352_v5  ;;  %v1362_v10 = vadd.f32 %v5351_v4, %v6383_v54 }
 0x10f   : > { %v1449_v11 = vcombine.high %v1441_v7, %v1441_v7  ;;  %v1450_v12 = vcombine.high %v1448_v8, %v1448_v8  ;;  %v6391_v13 = vrot.slane %v1441_v7, %v6160_v26  ;;  %v6394_v14 = vrot.slane %v1448_v8, %v6160_v26 }
 0x110   : > { %v1365_v15 = vadd.f32 %v5354_v9, %v6383_v54  ;;  %v1409_v23 = vmax.f32 %v1362_v10, 0.0 }
 0x111   : > { %v6398_v17 = vrot.slane %v1449_v11, %v6160_v26  ;;  %v6401_v18 = vrot.slane %v1450_v12, %v6160_v26  ;;  %v6405_v19 = vcombine.high %v6391_v13, %v6391_v13  ;;  %v5355_v20 = vpop.f32.mrb[8].mxu0  ;;  %v6413_v22 = vcombine.high %v6394_v14, %v6394_v14 }
 0x112   : > { %v1410_v24 = vmax.f32 %v1365_v15, 0.0  ;;  %v5356_v25 = vpop.f32.mrb[9].mxu0  ;;  %v1766_v27 = vshrl.u32 %v6391_v13, 16  ;;  %v1795_v40 = vshll.u32 %v6394_v14, 16 }
 0x113   : > { %v5357_v29 = vadd.f32 %v5356_v25, %v5355_v20  ;;  %v5358_v30 = vpop.f32.mrb[10].mxu0  ;;  %v6418_v31 = vcombine.high %v6398_v17, %v6398_v17  ;;  %v2495_v33 = vcombine.low %v6398_v17, %v6405_v19  ;;  %v5164_v34 = vcombine.high %v6394_v14, %v6401_v18 }
 0x114   : > { %v1421_v35 = vpack.c.bf16 %v1410_v24, %v1409_v23  ;;  %v5115_v36 = vpack.c.bf16 %v1410_v24, %v1410_v24  ;;  %v5359_v37 = vpop.f32.mrb[11].mxu0  ;;  %v1771_v39 = vshll.u32 %v6398_v17, 16  ;;  %v6437_v42 = vcombine.high %v6401_v18, %v6401_v18 }
 0x115   : > { %v1370_v28 = vadd.f32 %v5357_v29, %v6383_v54  ;;  %v5360_v32 = vadd.f32 %v5359_v37, %v5358_v30  ;;  %v2496_v41 = vcombine.low %v6418_v31, %v6394_v14  ;;  %v2505_v45 = vrot.slane %v2495_v33, %v6160_v26 }
 0x116   : > { %v1490_v43 = vrot.slane %v1421_v35, %v6160_v26  ;;  %v1497_v44 = vrot.slane %v5115_v36, %v6160_v26  ;;  %v2519_v46 = vrot.slane %v5164_v34, %v6160_v26  ;;  %v6447_v50 = vsel %vm6426_vm14, %v1766_v27, %v1771_v39 }
 0x117   : > { %v1411_v47 = vmax.f32 %v1370_v28, 0.0  ;;  %v1373_v48 = vadd.f32 %v5360_v32, %v6383_v54  ;;  %v2512_v49 = vrot.slane %v2496_v41, %v6160_v26  ;;  %v1774_v60 = vshrl.u32 %v6398_v17, 16 }
 0x118   : > { %v1498_v51 = vcombine.high %v1490_v43, %v1490_v43  ;;  %v1499_v53 = vcombine.high %v1497_v44, %v1497_v44  ;;  %v6450_v55 = vrot.slane %v1490_v43, %v6160_v26  ;;  %v6453_v56 = vrot.slane %v1497_v44, %v6160_v26 }
 0x119   : > { %v1412_v57 = vmax.f32 %v1373_v48, 0.0  ;;  %v5361_v58 = vpop.f32.mrb[12].mxu0  ;;  %v2527_v59 = vcombine.low %v2505_v45, %v2512_v49  ;;  %v1779_v61 = vshll.u32 %v6405_v19, 16  ;;  %v1782_v2 = vshrl.u32 %v6405_v19, 16 }
 0x11a   : > { %v6458_v62 = vrot.slane %v1498_v51, %v6160_v26  ;;  %v6461_v63 = vrot.slane %v1499_v53, %v6160_v26  ;;  %v5362_v0 = vpop.f32.mrb[13].mxu0  ;;  %v6465_v1 = vcombine.high %v6453_v56, %v6453_v56  ;;  %v1528_v7 = vcombine.high %v6450_v55, %v6450_v55 }
 0x11b   : > { %v1422_v3 = vpack.c.bf16 %v1412_v57, %v1411_v47  ;;  %v5116_v4 = vpack.c.bf16 %v1412_v57, %v1412_v57  ;;  %v5363_v5 = vadd.f32 %v5362_v0, %v5361_v58  ;;  %v5364_v6 = vpop.f32.mrb[14].mxu0  ;;  %v6477_v11 = vrot.slane %v2527_v59, %v6160_v26 }
 0x11c   : > { %v5365_v8 = vpop.f32.mrb[15].mxu0  ;;  %v6472_v9 = vcombine.high %v6458_v62, %v6458_v62  ;;  %v2498_v10 = vcombine.low %v6450_v55, %v6458_v62  ;;  %v2545_v12 = vcombine.low %v6461_v63, %v6465_v1  ;;  %v1861_v23 = vshll.u32 %v6465_v1, 16 }
 0x11d   : > { %v1539_v15 = vrot.slane %v1422_v3, %v6160_v26  ;;  %v1546_v19 = vrot.slane %v5116_v4, %v6160_v26  ;;  %v1378_v20 = vadd.f32 %v5363_v5, %v6383_v54  ;;  %v5366_v21 = vadd.f32 %v5365_v8, %v5364_v6 }
 0x11e   : > { %v2526_v24 = vrot.slane %v2498_v10, %v6160_v26  ;;  %v2544_v25 = vcombine.low %v6472_v9, %v6453_v56  ;;  %v2561_v27 = vrot.slane %v2545_v12, %v6160_v26  ;;  %v6494_v34 = vsel %vm6426_vm14, %v1774_v60, %v1779_v61 }
 0x11f   : > { %v1547_v29 = vcombine.high %v1539_v15, %v1539_v15  ;;  %v1548_v30 = vcombine.high %v1546_v19, %v1546_v19  ;;  %v6490_v33 = vrot.slane %v1546_v19, %v6160_v26  ;;  %v6497_v35 = vrot.slane %v1539_v15, %v6160_v26 }
 0x120   : > { %v1381_v36 = vadd.f32 %v5366_v21, %v6383_v54  ;;  %v2528_v37 = vcombine.low %v2519_v46, %v2526_v24  ;;  %v2554_v39 = vrot.slane %v2544_v25, %v6160_v26  ;;  %v1413_v41 = vmax.f32 %v1378_v20, 0.0 }
 0x121   : > { %v6502_v28 = vrot.slane %v1547_v29, %v6160_v26  ;;  %v6505_v32 = vrot.slane %v1548_v30, %v6160_v26  ;;  %v5367_v43 = vpop.f32.mrb[16].mxu0  ;;  %v1787_v44 = vshll.u32 %v6418_v31, 16  ;;  %v1790_v46 = vshrl.u32 %v6418_v31, 16 }
 0x122   : > { %v1414_v45 = vmax.f32 %v1381_v36, 0.0  ;;  %v5368_v47 = vpop.f32.mrb[17].mxu0  ;;  %v6509_v48 = vrot.slane %v2528_v37, %v6160_v26  ;;  %v2576_v49 = vcombine.low %v2554_v39, %v2561_v27  ;;  %v1898_v51 = vshrl.u32 %v6490_v33, 16 }
 0x123   : > { %v5369_v53 = vadd.f32 %v5368_v47, %v5367_v43  ;;  %v5370_v57 = vpop.f32.mrb[18].mxu0  ;;  %v1799_v58 = vshrl.u32 %v6401_v18, 16  ;;  %v1804_v59 = vshll.u32 %v6413_v22, 16  ;;  %v1789_v6 = vsel %vm6426_vm14, %v1782_v2, %v1787_v44 }
 0x124   : > { %v1423_v60 = vpack.c.bf16 %v1414_v45, %v1413_v41  ;;  %v5117_v61 = vpack.c.bf16 %v1414_v45, %v1414_v45  ;;  %v5371_v0 = vpop.f32.mrb[19].mxu0  ;;  %v2543_v3 = vcombine.low %v6477_v11, %v6509_v48  ;;  %v6518_v4 = vrot.slane %v2576_v49, %v6160_v26  ;;  %v5846_v11 = vld [vmem:[%s7599_s3 + $0x188] sm:$0xff]  }
 0x125   : > { %v1386_v5 = vadd.f32 %v5369_v53, %v6383_v54  ;;  %v5372_v31 = vadd.f32 %v5371_v0, %v5370_v57  ;;  %v1797_v8 = vsel %vm6426_vm14, %v1790_v46, %v1795_v40  ;;  %v1806_v19 = vsel %vm6426_vm14, %v1799_v58, %v1804_v59 }
 0x126   : > { %v1588_v10 = vrot.slane %v1423_v60, %v6160_v26  ;;  %v1595_v12 = vrot.slane %v5117_v61, %v6160_v26  ;;  %v2759_v15 = vcombine.low %v6509_v48, %v6518_v4  ;;  %v1807_v2 = vshrl.u32 %v6413_v22, 16 }
 0x127   : > { %v1415_v20 = vmax.f32 %v1386_v5, 0.0  ;;  %v1389_v21 = vadd.f32 %v5372_v31, %v6383_v54  ;;  %v1812_v14 = vshll.u32 %v6437_v42, 16  ;;  %v1815_v27 = vshrl.u32 %v6437_v42, 16 }
 0x128   : > { %v1596_v24 = vcombine.high %v1588_v10, %v1588_v10  ;;  %v1597_v25 = vcombine.high %v1595_v12, %v1595_v12  ;;  %v6537_v40 = vrot.slane %v1588_v10, %v6160_v26  ;;  %3614 = vmatprep.mubr.bf16.mxu0 %v2759_v15  ;;  %v6541_v29 = vrot.slane %v1595_v12, %v6160_v26 }
 0x129   : > { %v1416_v30 = vmax.f32 %v1389_v21, 0.0  ;;  %v1814_v36 = vsel %vm6426_vm14, %v1807_v2, %v1812_v14  ;;  %v1820_v37 = vshll.u32 %v6450_v55, 16  ;;  %v5373_v39 = vpop.f32.mrb[20].mxu0  ;;  %v1823_v45 = vshrl.u32 %v6450_v55, 16 }
 0x12a   : > { %v6547_v41 = vrot.slane %v1596_v24, %v6160_v26  ;;  %v6550_v43 = vrot.slane %v1597_v25, %v6160_v26  ;;  %v6554_v44 = vcombine.high %v6537_v40, %v6537_v40  ;;  %v5374_v47 = vpop.f32.mrb[21].mxu0  ;;  %v1828_v57 = vshll.u32 %v6458_v62, 16 }
 0x12b   : > { %v1424_v49 = vpack.c.bf16 %v1416_v30, %v1415_v20  ;;  %v5118_v46 = vpack.c.bf16 %v1416_v30, %v1416_v30  ;;  %v1822_v53 = vsel %vm6426_vm14, %v1815_v27, %v1820_v37  ;;  %v5376_v58 = vpop.f32.mrb[22].mxu0  ;;  %v1927_v60 = vshll.u32 %v6537_v40, 16 }
 0x12c   : > { %v6562_v59 = vcombine.high %v6547_v41, %v6547_v41  ;;  %v1837_v61 = vshll.u32 %v6472_v9, 16  ;;  %v1840_v0 = vshrl.u32 %v6472_v9, 16  ;;  %v5377_v5 = vpop.f32.mrb[23].mxu0  ;;  %v1830_v12 = vsel %vm6426_vm14, %v1823_v45, %v1828_v57 }
 0x12d   : > { %v1637_v31 = vrot.slane %v1424_v49, %v6160_v26  ;;  %v6569_v10 = vrot.slane %v5118_v46, %v6160_v26  ;;  %v1832_v15 = vshrl.u32 %v1528_v7, 16  ;;  %v1845_v20 = vshll.u32 %v6453_v56, 16 }
 0x12e   : > { %v1848_v21 = vshrl.u32 %v6453_v56, 16  ;;  %v1853_v2 = vshll.u32 %v6461_v63, 16  ;;  %v1856_v9 = vshrl.u32 %v6461_v63, 16  ;;  %v2295_v45 = vcombine.low %v6447_v50, %v6494_v34 }
 0x12f   : > { %v1645_v14 = vcombine.high %v1637_v31, %v1637_v31  ;;  %v1646_v24 = vcombine.high %v6569_v10, %v6569_v10  ;;  %v6583_v25 = vrot.slane %v1637_v31, %v6160_v26  ;;  %v1839_v27 = vsel %vm6426_vm14, %v1832_v15, %v1837_v61 }
 0x130   : > { %v1847_v7 = vsel %vm6426_vm14, %v1840_v0, %v1845_v20  ;;  %v1855_v30 = vsel %vm6426_vm14, %v1848_v21, %v1853_v2  ;;  %v1863_v37 = vsel %vm6426_vm14, %v1856_v9, %v1861_v23  ;;  %v6599_v49 = vrot.slane %v6569_v10, %v6160_v26  ;;  %v5830_v10 = vld [vmem:[%s7599_s3 + $0x210] sm:$0xff]  }
 0x131   : > { %v6602_v46 = vrot.slane %v1645_v14, %v6160_v26  ;;  %v2296_v57 = vcombine.low %v1789_v6, %v1797_v8  ;;  %v2297_v61 = vcombine.low %v1806_v19, %v1814_v36  ;;  %v6604_v0 = vpop.f32.mrb[24].mxu0  ;;  %v2298_v31 = vcombine.low %v1822_v53, %v1830_v12 }
 0x132   : > { %v2305_v1 = vrot.slane %v2295_v45, %v6160_v26  ;;  %v2344_v15 = vcombine.low %v1839_v27, %v1847_v7  ;;  %v2345_v20 = vcombine.low %v1855_v30, %v1863_v37  ;;  %v6607_v23 = vpop.f32.mrb[25].mxu0  ;;  %v2095_v21 = vcombine.low %v6391_v13, %v6398_v17 }
 0x133   : > { %v2312_v50 = vrot.slane %v2296_v57, %v6160_v26  ;;  %v2319_v34 = vrot.slane %v2297_v61, %v6160_v26  ;;  %v5160_v6 = vcombine.high %v6391_v13, %v6398_v17  ;;  %v5382_v8 = vpop.f32.mrb[26].mxu0  ;;  %v2326_v19 = vrot.slane %v2298_v31, %v6160_v26 }
 0x134   : > { %v2354_v36 = vrot.slane %v2344_v15, %v6160_v26  ;;  %v2361_v53 = vrot.slane %v2345_v20, %v6160_v26  ;;  %v2097_v12 = vcombine.low %v6401_v18, %v6413_v22  ;;  %v5383_v2 = vpop.f32.mrb[27].mxu0  ;;  %v2098_v14 = vcombine.low %v6437_v42, %v6450_v55 }
 0x135   : > { %v2327_v9 = vcombine.low %v2305_v1, %v2312_v50  ;;  %v2105_v27 = vrot.slane %v2095_v21, %v6160_v26  ;;  %v2112_v7 = vrot.slane %v5160_v6, %v6160_v26  ;;  %v2328_v13 = vcombine.low %v2319_v34, %v2326_v19  ;;  %v5827_v21 = vld [vmem:[%s7599_s3 + $0x208] sm:$0xff]  }
 0x136   : > { %v2376_v17 = vcombine.low %v2354_v36, %v2361_v53  ;;  %v2119_v30 = vrot.slane %v2097_v12, %v6160_v26  ;;  %v5375_v37 = vadd.f32 %v5374_v47, %v5373_v39  ;;  %v2126_v57 = vrot.slane %v2098_v14, %v6160_v26  ;;  %v5820_v53 = vld [vmem:[%s7599_s3 + $0x80] sm:$0xff]  }
 0x137   : > { %v2335_v45 = vrot.slane %v2327_v9, %v6160_v26  ;;  %v2127_v61 = vcombine.low %v2105_v27, %v2112_v7  ;;  %v5378_v18 = vadd.f32 %v5377_v5, %v5376_v58  ;;  %v2342_v22 = vrot.slane %v2328_v13, %v6160_v26 }
 0x138   : > { %v6629_v31 = vrot.slane %v2376_v17, %v6160_v26  ;;  %v1394_v42 = vadd.f32 %v5375_v37, %v6383_v54  ;;  %v6634_v1 = vcombine.high %v6461_v63, %v6461_v63  ;;  %v2128_v15 = vcombine.low %v2119_v30, %v2126_v57  ;;  %v5821_v17 = vld [vmem:[%s7599_s3 + $0xc8] sm:$0xff]  }
 0x139   : > { %v2135_v39 = vrot.slane %v2127_v61, %v6160_v26  ;;  %v1397_v47 = vadd.f32 %v5378_v18, %v6383_v54  ;;  %v1577_v20 = vcombine.high %v6497_v35, %v6497_v35  ;;  %v2343_v58 = vcombine.low %v2335_v45, %v2342_v22 }
 0x13a   : > { %v2727_v5 = vcombine.low %v2342_v22, %v6629_v31  ;;  %v1417_v50 = vmax.f32 %v1394_v42, 0.0  ;;  %v1579_v34 = vcombine.high %v6502_v28, %v6502_v28  ;;  %v6647_v6 = vrot.slane %v2128_v15, %v6160_v26 }
 0x13b   : > { %v1418_v8 = vmax.f32 %v1397_v47, 0.0  ;;  %v1865_v19 = vshrl.u32 %v6634_v1, 16  ;;  %v1870_v36 = vshll.u32 %v6497_v35, 16  ;;  %3484 = vmatprep.mubr.bf16.mxu1 %v2343_v58  ;;  %v1873_v12 = vshrl.u32 %v6497_v35, 16 }
 0x13c   : > { %3615 = vmatmul.mubr.bf16.vlgmr.msra.gmra.mrb[28].mxu0 %v2727_v5  ;;  %v1878_v2 = vshll.u32 %v6502_v28, 16  ;;  %v1881_v9 = vshrl.u32 %v6502_v28, 16  ;;  %v1886_v14 = vshll.u32 %v1577_v20, 16  ;;  %v2143_v27 = vcombine.low %v2135_v39, %v6647_v6 }
 0x13d   : > { %v1425_v7 = vpack.c.bf16 %v1418_v8, %v1417_v50  ;;  %v5119_v13 = vpack.c.bf16 %v1418_v8, %v1418_v8  ;;  %v1872_v30 = vsel %vm6426_vm14, %v1865_v19, %v1870_v36  ;;  %5664 = vmatpush3.bf16.msra.mxu0 %v6377_v52  ;;  %v6668_v37 = vrot.slane %v1646_v24, %v6160_v26  ;;  %v5822_v24 = vld [vmem:[%s7599_s3 + $0x88] sm:$0xff]  }
 0x13e   : > { %v1880_v45 = vsel %vm6426_vm14, %v1873_v12, %v1878_v2  ;;  %v1889_v57 = vshrl.u32 %v1577_v20, 16  ;;  %v1894_v61 = vshll.u32 %v1579_v34, 16  ;;  %5665 = vmatprep.subr.bf16.mxu0 %v5827_v21  ;;  %3485 = vmatmul.mubr.bf16.vlgmr.msra.gmra.mrb[0].mxu1 %v2143_v27  ;;  %v5161_v52 = vcombine.high %v6450_v55, %v6458_v62  ;;  %v5823_v34 = vld [vmem:[%s7599_s3 + $0xd0] sm:$0xff]   ;;  %v5833_v12 = vld [vmem:[%s7599_s3 + $0x218] sm:$0xff]  }
 0x13f   : > { %v1686_v18 = vrot.slane %v1425_v7, %v6160_v26  ;;  %v1693_v22 = vrot.slane %v5119_v13, %v6160_v26  ;;  %v2346_v42 = vcombine.low %v1872_v30, %v1880_v45  ;;  %5426 = vmatpush3.bf16.msra.mxu1 %v5820_v53  ;;  %v2145_v39 = vcombine.low %v6453_v56, %v6461_v63  ;;  %v5825_v27 = vld [vmem:[%s7599_s3 + $0x90] sm:$0xff]   ;;  %v5826_v45 = vld [vmem:[%s7599_s3 + $0xd8] sm:$0xff]  }
 0x140   : > { %v1896_v15 = vsel %vm6426_vm14, %v1889_v57, %v1894_v61  ;;  %v2146_v47 = vcombine.low %v6634_v1, %v6497_v35  ;;  %v2147_v55 = vcombine.low %v6502_v28, %v1577_v20  ;;  %5427 = vmatprep.subr.bf16.mxu1 %v5821_v17  ;;  %v1888_v50 = vsel %vm6426_vm14, %v1881_v9, %v1886_v14 }
 0x141   : > { %v1694_v62 = vcombine.high %v1686_v18, %v1686_v18  ;;  %v1695_v58 = vcombine.high %v1693_v22, %v1693_v22  ;;  %v6690_v5 = vrot.slane %v1693_v22, %v6160_v26  ;;  %v6698_v56 = vrot.slane %v1686_v18, %v6160_v26  ;;  %5666 = vmatpush3.bf16.msra.mxu0 %v5827_v21 }
 0x142   : > { %v2347_v63 = vcombine.low %v1888_v50, %v1896_v15  ;;  %v2154_v1 = vrot.slane %v5161_v52, %v6160_v26  ;;  %v2161_v20 = vrot.slane %v2145_v39, %v6160_v26  ;;  %v2368_v53 = vrot.slane %v2346_v42, %v6160_v26  ;;  %5667 = vmatprep.subr.bf16.mxu0 %v5830_v10  ;;  %v5836_v39 = vld [vmem:[%s7599_s3 + $0x220] sm:$0xff]  }
 0x143   : > { %v6703_v8 = vrot.slane %v1694_v62, %v6160_v26  ;;  %v6706_v19 = vrot.slane %v1695_v58, %v6160_v26  ;;  %v6710_v36 = vcombine.high %v6690_v5, %v6690_v5  ;;  %v2030_v2 = vshrl.u32 %v6698_v56, 16  ;;  %5428 = vmatpush3.bf16.msra.mxu1 %v5822_v24 }
 0x144   : > { %v2375_v21 = vrot.slane %v2347_v63, %v6160_v26  ;;  %v2168_v9 = vrot.slane %v2146_v47, %v6160_v26  ;;  %v2175_v14 = vrot.slane %v2147_v55, %v6160_v26  ;;  %v2059_v7 = vshll.u32 %v6690_v5, 16  ;;  %5429 = vmatprep.subr.bf16.mxu1 %v5823_v34  ;;  %v5828_v55 = vld [vmem:[%s7599_s3 + $0x98] sm:$0xff]  }
 0x145   : > { %v2176_v13 = vcombine.low %v2154_v1, %v2161_v20  ;;  %v1578_v17 = vcombine.high %v6490_v33, %v6490_v33  ;;  %v1580_v30 = vcombine.high %v6505_v32, %v6505_v32  ;;  %v2546_v18 = vcombine.low %v6497_v35, %v6502_v28  ;;  %5668 = vmatpush3.bf16.msra.mxu0 %v5830_v10 }
 0x146   : > { %v2377_v57 = vcombine.low %v2368_v53, %v2375_v21  ;;  %v2177_v61 = vcombine.low %v2168_v9, %v2175_v14  ;;  %v5165_v22 = vcombine.high %v6497_v35, %v6502_v28  ;;  %v1903_v15 = vshll.u32 %v6505_v32, 16  ;;  %5669 = vmatprep.subr.bf16.mxu0 %v5833_v12  ;;  %v5829_v21 = vld [vmem:[%s7599_s3 + $0xe0] sm:$0xff]  }
 0x147   : > { %v6736_v42 = vrot.slane %v2176_v13, %v6160_v26  ;;  %v2593_v52 = vcombine.low %v6505_v32, %v1578_v17  ;;  %v2594_v24 = vcombine.low %v1580_v30, %v6537_v40  ;;  %5430 = vmatpush3.bf16.msra.mxu1 %v5825_v27  ;;  %v2568_v28 = vrot.slane %v2546_v18, %v6160_v26 }
 0x148   : > { %v6745_v47 = vrot.slane %v2377_v57, %v6160_v26  ;;  %v6748_v35 = vrot.slane %v2177_v61, %v6160_v26  ;;  %v2575_v10 = vrot.slane %v5165_v22, %v6160_v26  ;;  %5431 = vmatprep.subr.bf16.mxu1 %v5826_v45  ;;  %v1905_v50 = vsel %vm6426_vm14, %v1898_v51, %v1903_v15 }
 0x149   : > { %v2603_v62 = vrot.slane %v2593_v52, %v6160_v26  ;;  %v2610_v58 = vrot.slane %v2594_v24, %v6160_v26  ;;  %v1906_v34 = vshrl.u32 %v6505_v32, 16  ;;  %v1911_v53 = vshll.u32 %v1578_v17, 16  ;;  %5670 = vmatpush3.bf16.msra.mxu0 %v5833_v12 }
 0x14a   : > { %v6764_v63 = vcombine.low %v6629_v31, %v6745_v47  ;;  %v6768_v1 = vcombine.low %v6736_v42, %v6748_v35  ;;  %v2577_v20 = vcombine.low %v2568_v28, %v2575_v10  ;;  %v1914_v14 = vshrl.u32 %v1578_v17, 16  ;;  %5671 = vmatprep.subr.bf16.mxu0 %v5836_v39  ;;  %v5839_v31 = vld [vmem:[%s7599_s3 + $0x228] sm:$0xff]  }
 0x14b   : > { %v2625_v9 = vcombine.low %v2603_v62, %v2610_v58  ;;  %v1919_v51 = vshll.u32 %v1580_v30, 16  ;;  %v1922_v27 = vshrl.u32 %v1580_v30, 16  ;;  %v1913_v45 = vsel %vm6426_vm14, %v1906_v34, %v1911_v53  ;;  %5432 = vmatpush3.bf16.msra.mxu1 %v5828_v55  ;;  %v5831_v30 = vld [vmem:[%s7599_s3 + $0xa0] sm:$0xff]   ;;  %v5832_v10 = vld [vmem:[%s7599_s3 + $0xe8] sm:$0xff]  }
 0x14c   : > { %3492 = vmatprep.mubr.bf16.mxu1 %v6764_v63  ;;  %v6778_v13 = vrot.slane %v2577_v20, %v6160_v26  ;;  %v1931_v12 = vshrl.u32 %v6547_v41, 16  ;;  %v1936_v17 = vshll.u32 %v6554_v44, 16  ;;  %v2393_v22 = vcombine.low %v1905_v50, %v1913_v45  ;;  %5433 = vmatprep.subr.bf16.mxu1 %v5829_v21 }
 0x14d   : > { %3493 = vmatmul.mubr.bf16.gmra.mrb[4].mxu1 %v6768_v1  ;;  %v6789_v57 = vrot.slane %v2625_v9, %v6160_v26  ;;  %v1921_v61 = vsel %vm6426_vm14, %v1914_v14, %v1919_v51  ;;  %v1929_v18 = vsel %vm6426_vm14, %v1922_v27, %v1927_v60  ;;  %v1939_v15 = vshrl.u32 %v6554_v44, 16  ;;  %5672 = vmatpush3.bf16.msra.mxu0 %v5836_v39  ;;  %v5834_v39 = vld [vmem:[%s7599_s3 + $0xa8] sm:$0xff]   ;;  %v5835_v27 = vld [vmem:[%s7599_s3 + $0xf0] sm:$0xff]  }
 0x14e   : > { %v2394_v52 = vcombine.low %v1921_v61, %v1929_v18  ;;  %v1938_v24 = vsel %vm6426_vm14, %v1931_v12, %v1936_v17  ;;  %v1944_v28 = vshll.u32 %v6562_v59, 16  ;;  %v2403_v60 = vrot.slane %v2393_v22, %v6160_v26  ;;  %5673 = vmatprep.subr.bf16.mxu0 %v5839_v31  ;;  %v5842_v61 = vld [vmem:[%s7599_s3 + $0x230] sm:$0xff]  }
 0x14f   : > { %v2760_v55 = vcombine.low %v6778_v13, %v6789_v57  ;;  %v1947_v62 = vshrl.u32 %v6562_v59, 16  ;;  %v1952_v58 = vshll.u32 %v6541_v29, 16  ;;  %v1955_v20 = vshrl.u32 %v6541_v29, 16  ;;  %5434 = vmatpush3.bf16.msra.mxu1 %v5831_v30 }
 0x150   : > { %v2410_v50 = vrot.slane %v2394_v52, %v6160_v26  ;;  %v1946_v34 = vsel %vm6426_vm14, %v1939_v15, %v1944_v28  ;;  %v1960_v53 = vshll.u32 %v6550_v43, 16  ;;  %v2193_v14 = vcombine.low %v6490_v33, %v6505_v32  ;;  %5435 = vmatprep.subr.bf16.mxu1 %v5832_v10 }
 0x151   : > { %3622 = vmatprep.mubr.bf16.mxu0 %v2760_v55  ;;  %v1954_v21 = vsel %vm6426_vm14, %v1947_v62, %v1952_v58  ;;  %v2395_v9 = vcombine.low %v1938_v24, %v1946_v34  ;;  %v5162_v51 = vcombine.high %v6490_v33, %v6505_v32  ;;  %v2195_v17 = vcombine.low %v6547_v41, %v6554_v44 }
 0x152   : > { %v2425_v45 = vcombine.low %v2403_v60, %v2410_v50  ;;  %v1962_v12 = vsel %vm6426_vm14, %v1955_v20, %v1960_v53  ;;  %v2196_v30 = vcombine.low %v6562_v59, %v6541_v29  ;;  %v2203_v18 = vrot.slane %v2193_v14, %v6160_v26  ;;  %5674 = vmatpush3.bf16.msra.mxu0 %v5839_v31  ;;  %v5837_v31 = vld [vmem:[%s7599_s3 + $0xb0] sm:$0xff]   ;;  %v5845_v60 = vld [vmem:[%s7599_s3 + $0x238] sm:$0xff]  }
 0x153   : > { %v2396_v33 = vcombine.low %v1954_v21, %v1962_v12  ;;  %v2417_v32 = vrot.slane %v2395_v9, %v6160_v26  ;;  %v2210_v22 = vrot.slane %v5162_v51, %v6160_v26  ;;  %v2217_v44 = vrot.slane %v2195_v17, %v6160_v26  ;;  %5436 = vmatpush3.bf16.msra.mxu1 %v5834_v39 }
 0x154   : > { %v2433_v52 = vrot.slane %v2425_v45, %v6160_v26  ;;  %v2224_v24 = vrot.slane %v2196_v30, %v6160_v26  ;;  %v1629_v59 = vcombine.high %v6550_v43, %v6550_v43  ;;  %v1675_v10 = vcombine.high %v6583_v25, %v6583_v25  ;;  %5437 = vmatprep.subr.bf16.mxu1 %v5835_v27 }
 0x155   : > { %v2424_v15 = vrot.slane %v2396_v33, %v6160_v26  ;;  %v2225_v28 = vcombine.low %v2203_v18, %v2210_v22  ;;  %v5166_v55 = vcombine.high %v6537_v40, %v6547_v41  ;;  %v2596_v50 = vcombine.low %v6541_v29, %v6550_v43  ;;  %v5838_v40 = vld [vmem:[%s7599_s3 + $0xf8] sm:$0xff]   ;;  %5675 = vmatprep.subr.bf16.mxu0 %v5842_v61 }
 0x156   : > { %v2728_v62 = vcombine.low %v6745_v47, %v2433_v52  ;;  %v2226_v58 = vcombine.low %v2217_v44, %v2224_v24  ;;  %v2642_v34 = vcombine.low %v1629_v59, %v6583_v25  ;;  %v1993_v53 = vshll.u32 %v1675_v10, 16  ;;  %5676 = vmatpush3.bf16.msra.mxu0 %v5842_v61  ;;  %v5840_v24 = vld [vmem:[%s7599_s3 + $0xb8] sm:$0xff]  }
 0x157   : > { %v2426_v41 = vcombine.low %v2417_v32, %v2424_v15  ;;  %v6862_v20 = vrot.slane %v2225_v28, %v6160_v26  ;;  %v2617_v39 = vrot.slane %v5166_v55, %v6160_v26  ;;  %v2624_v21 = vrot.slane %v2596_v50, %v6160_v26  ;;  %5438 = vmatpush3.bf16.msra.mxu1 %v5837_v31 }
 0x158   : > { %3623 = vmatmul.mubr.bf16.gmra.mrb[32].mxu0 %v2728_v62  ;;  %v6866_v47 = vrot.slane %v2226_v58, %v6160_v26  ;;  %v2643_v9 = vcombine.low %v6602_v46, %v1675_v10  ;;  %v2652_v14 = vrot.slane %v2642_v34, %v6160_v26  ;;  %v1627_v27 = vcombine.high %v6541_v29, %v6541_v29 }
 0x159   : > { %v6872_v51 = vrot.slane %v2426_v41, %v6160_v26  ;;  %v1969_v45 = vshll.u32 %v1629_v59, 16  ;;  %v1972_v12 = vshrl.u32 %v1629_v59, 16  ;;  %5677 = vmatprep.subr.bf16.mxu0 %v5845_v60  ;;  %v2626_v30 = vcombine.low %v2617_v39, %v2624_v21  ;;  %5439 = vmatprep.subr.bf16.mxu1 %v5838_v40 }
 0x15a   : > { %v6878_v17 = vcombine.low %v6862_v20, %v6866_v47  ;;  %v2659_v61 = vrot.slane %v2643_v9, %v6160_v26  ;;  %v1977_v33 = vshll.u32 %v6583_v25, 16  ;;  %v1964_v18 = vshrl.u32 %v1627_v27, 16  ;;  %5678 = vmatpush3.bf16.msra.mxu0 %v5845_v60 }
 0x15b   : > { %v6883_v32 = vcombine.low %v2433_v52, %v6872_v51  ;;  %v1980_v22 = vshrl.u32 %v6583_v25, 16  ;;  %v1985_v44 = vshll.u32 %v6602_v46, 16  ;;  %v2640_v59 = vrot.slane %v2626_v30, %v6160_v26  ;;  %v5841_v52 = vld [vmem:[%s7599_s3 + $0x1c0] sm:$0xff]   ;;  %5440 = vmatpush3.bf16.msra.mxu1 %v5840_v24 }
 0x15c   : > { %v2674_v15 = vcombine.low %v2652_v14, %v2659_v61  ;;  %v1979_v28 = vsel %vm6426_vm14, %v1972_v12, %v1977_v33  ;;  %v1988_v10 = vshrl.u32 %v6602_v46, 16  ;;  %v1971_v55 = vsel %vm6426_vm14, %v1964_v18, %v1969_v45  ;;  %5505 = vmatprep.subr.bf16.mxu1 %v5841_v52 }
 0x15d   : > { %3500 = vmatprep.mubr.bf16.mxu1 %v6883_v32  ;;  %v1987_v31 = vsel %vm6426_vm14, %v1980_v22, %v1985_v44  ;;  %v5381_v60 = vadd.f32 %v6607_v23, %v6604_v0  ;;  %v1676_v62 = vcombine.high %v6599_v49, %v6599_v49  ;;  %v6908_v58 = vcombine.low %v6789_v57, %v2640_v59 }
 0x15e   : > { %3501 = vmatmul.mubr.bf16.gmra.mrb[8].mxu1 %v6878_v17  ;;  %v6911_v50 = vrot.slane %v2674_v15, %v6160_v26  ;;  %v1995_v34 = vsel %vm6426_vm14, %v1988_v10, %v1993_v53  ;;  %v2442_v40 = vcombine.low %v1971_v55, %v1979_v28  ;;  %v1677_v0 = vcombine.high %v6602_v46, %v6602_v46 }
 0x15f   : > { %v2443_v41 = vcombine.low %v1987_v31, %v1995_v34  ;;  %v1402_v39 = vadd.f32 %v5381_v60, %v6383_v54  ;;  %v1678_v23 = vcombine.high %v6668_v37, %v6668_v37  ;;  %v2002_v9 = vshll.u32 %v6599_v49, 16 }
 0x160   : > { %v2761_v57 = vcombine.low %v2640_v59, %v6911_v50  ;;  %v2452_v21 = vrot.slane %v2442_v40, %v6160_v26  ;;  %v2005_v14 = vshrl.u32 %v6599_v49, 16  ;;  %v1997_v54 = vshrl.u32 %v1677_v0, 16 }
 0x161   : > { %v2459_v53 = vrot.slane %v2443_v41, %v6160_v26  ;;  %v1419_v27 = vmax.f32 %v1402_v39, 0.0  ;;  %v2010_v45 = vshll.u32 %v6668_v37, 16  ;;  %v2013_v12 = vshrl.u32 %v6668_v37, 16 }
 0x162   : > { %3630 = vmatprep.mubr.bf16.mxu0 %v2761_v57  ;;  %v2018_v30 = vshll.u32 %v1676_v62, 16  ;;  %v2021_v61 = vshrl.u32 %v1676_v62, 16  ;;  %v2026_v33 = vshll.u32 %v1678_v23, 16  ;;  %v2004_v44 = vsel %vm6426_vm14, %v1997_v54, %v2002_v9 }
 0x163   : > { %v2474_v18 = vcombine.low %v2452_v21, %v2459_v53  ;;  %v1426_v22 = vpack.c.bf16 %v1419_v27, %v1419_v27  ;;  %v2012_v24 = vsel %vm6426_vm14, %v2005_v14, %v2010_v45  ;;  %v5163_v10 = vcombine.high %v6541_v29, %v6550_v43 }
 0x164   : > { %v2020_v59 = vsel %vm6426_vm14, %v2013_v12, %v2018_v30  ;;  %v2028_v15 = vsel %vm6426_vm14, %v2021_v61, %v2026_v33  ;;  %v2444_v28 = vcombine.low %v2004_v44, %v2012_v24  ;;  %v2243_v60 = vcombine.low %v6583_v25, %v6602_v46 }
 0x165   : > { %v2482_v52 = vrot.slane %v2474_v18, %v6160_v26  ;;  %v1734_v55 = vrot.slane %v1426_v22, %v6160_v26  ;;  %v2445_v31 = vcombine.low %v2020_v59, %v2028_v15  ;;  %v2244_v40 = vcombine.low %v1677_v0, %v6599_v49 }
 0x166   : > { %v2466_v34 = vrot.slane %v2444_v28, %v6160_v26  ;;  %v2245_v41 = vcombine.low %v6668_v37, %v1676_v62  ;;  %v2252_v39 = vrot.slane %v5163_v10, %v6160_v26  ;;  %v2259_v21 = vrot.slane %v2243_v60, %v6160_v26 }
 0x167   : > { %v2729_v23 = vcombine.low %v6872_v51, %v2482_v52  ;;  %v1735_v57 = vcombine.high %v1734_v55, %v1734_v55  ;;  %v6947_v29 = vrot.slane %v1734_v55, %v6160_v26  ;;  %v2473_v43 = vrot.slane %v2445_v31, %v6160_v26 }
 0x168   : > { %v2266_v25 = vrot.slane %v2244_v40, %v6160_v26  ;;  %v2273_v46 = vrot.slane %v2245_v41, %v6160_v26  ;;  %v2695_v0 = vcombine.low %v6647_v6, %v6736_v42  ;;  %v6957_v62 = vcombine.high %v6706_v19, %v6706_v19 }
 0x169   : > { %3631 = vmatmul.mubr.bf16.gmra.mrb[36].mxu0 %v2729_v23  ;;  %v6960_v51 = vrot.slane %v1735_v57, %v6160_v26  ;;  %v2084_v9 = vshll.u32 %v6947_v29, 16  ;;  %v2475_v14 = vcombine.low %v2466_v34, %v2473_v43  ;;  %v2274_v53 = vcombine.low %v2252_v39, %v2259_v21 }
 0x16a   : > { %v2275_v27 = vcombine.low %v2266_v25, %v2273_v46  ;;  %v1724_v54 = vcombine.high %v6698_v56, %v6698_v56  ;;  %v1726_v45 = vcombine.high %v6703_v8, %v6703_v8  ;;  %v2087_v6 = vshrl.u32 %v6947_v29, 16 }
 0x16b   : > { %v2844_v42 = vcombine.low %v6947_v29, %v6960_v51  ;;  %v6971_v12 = vrot.slane %v2475_v14, %v6160_v26  ;;  %v2644_v30 = vcombine.low %v6599_v49, %v6668_v37  ;;  %v6976_v61 = vrot.slane %v2274_v53, %v6160_v26 }
 0x16c   : > { %v6979_v33 = vrot.slane %v2275_v27, %v6160_v26  ;;  %v5167_v18 = vcombine.high %v6599_v49, %v6668_v37  ;;  %v2762_v22 = vcombine.low %v6703_v8, %v1724_v54  ;;  %v2763_v59 = vcombine.low %v1726_v45, %v6690_v5 }
 0x16d   : > { %v6985_v44 = vcombine.low %v2482_v52, %v6971_v12  ;;  %v2666_v24 = vrot.slane %v2644_v30, %v6160_v26  ;;  %v2035_v15 = vshll.u32 %v6703_v8, 16  ;;  %v2038_v49 = vshrl.u32 %v6703_v8, 16 }
 0x16e   : > { %v6992_v28 = vcombine.low %v6976_v61, %v6979_v33  ;;  %v2673_v10 = vrot.slane %v5167_v18, %v6160_v26  ;;  %v2770_v55 = vrot.slane %v2762_v22, %v6160_v26  ;;  %v2777_v37 = vrot.slane %v2763_v59, %v6160_v26 }
 0x16f   : > { %3508 = vmatprep.mubr.bf16.mxu1 %v6985_v44  ;;  %v2037_v52 = vsel %vm6426_vm14, %v2030_v2, %v2035_v15  ;;  %v2043_v31 = vshll.u32 %v1724_v54, 16  ;;  %v2046_v60 = vshrl.u32 %v1724_v54, 16  ;;  %v2092_v34 = vshll.u32 %v6960_v51, 16 }
 0x170   : > { %3509 = vmatmul.mubr.bf16.gmra.mrb[12].mxu1 %v6992_v28  ;;  %v2675_v40 = vcombine.low %v2666_v24, %v2673_v10  ;;  %v2051_v41 = vshll.u32 %v1726_v45, 16  ;;  %v2054_v39 = vshrl.u32 %v1726_v45, 16  ;;  %v2778_v23 = vcombine.low %v2770_v55, %v2777_v37 }
 0x171   : > { %3549 = vmatprep.mubr.bf16.mxu1 %v2695_v0  ;;  %v2045_v57 = vsel %vm6426_vm14, %v2038_v49, %v2043_v31  ;;  %v2696_v43 = vcombine.low %v6748_v35, %v6862_v20  ;;  %v2697_v2 = vcombine.low %v6866_v47, %v6976_v61  ;;  %v5169_v35 = vcombine.high %v6690_v5, %v6706_v19  ;;  %v5843_v5 = vld [vmem:[%s7599_s3 + $0x180] sm:$0xff]   ;;  %v5854_v61 = vld [vmem:[%s7599_s3 + $0x1a8] sm:$0xff]  }
 0x172   : > { %v2689_v21 = vrot.slane %v2675_v40, %v6160_v26  ;;  %v2053_v25 = vsel %vm6426_vm14, %v2046_v60, %v2051_v41  ;;  %v2061_v46 = vsel %vm6426_vm14, %v2054_v39, %v2059_v7  ;;  %v2730_v0 = vcombine.low %v2037_v52, %v2045_v57  ;;  %v5852_v47 = vld [vmem:[%s7599_s3 + $0x1a0] sm:$0xff]  }
 0x173   : > { %v7019_v51 = vrot.slane %v2778_v23, %v6160_v26  ;;  %v2731_v14 = vcombine.low %v2053_v25, %v2061_v46  ;;  %v2858_v20 = vrot.slane %v2844_v42, %v6160_v26  ;;  %v2698_v54 = vcombine.low %v6698_v56, %v6703_v8  ;;  %v5850_v25 = vld [vmem:[%s7599_s3 + $0x198] sm:$0xff]  }
 0x174   : > { %v2738_v53 = vrot.slane %v2730_v0, %v6160_v26  ;;  %v7026_v27 = vcombine.low %v6911_v50, %v2689_v21  ;;  %v5168_v7 = vcombine.high %v6698_v56, %v6703_v8  ;;  %v2851_v42 = vrot.slane %v5169_v35, %v6160_v26  ;;  %v5844_v50 = vld [vmem:[%s7599_s3 + $0x1c8] sm:$0xff]   ;;  %v5851_v0 = vld [vmem:[%s7599_s3 + $0x1e0] sm:$0xff]   ;;  %v5856_v35 = vld [vmem:[%s7599_s3 + $0x1b0] sm:$0xff]  }
 0x175   : > { %v2786_v45 = vcombine.low %v2689_v21, %v7019_v51  ;;  %v2745_v30 = vrot.slane %v2731_v14, %v6160_v26  ;;  %v2063_v18 = vshrl.u32 %v6706_v19, 16  ;;  %v2706_v22 = vrot.slane %v2698_v54, %v6160_v26 }
 0x176   : > { %v2713_v56 = vrot.slane %v5168_v7, %v6160_v26  ;;  %v2068_v8 = vshll.u32 %v6710_v36, 16  ;;  %v2071_v24 = vshrl.u32 %v6710_v36, 16  ;;  %v2859_v15 = vcombine.low %v2851_v42, %v2858_v20  ;;  %v5858_v20 = vld [vmem:[%s7599_s3 + $0x1b8] sm:$0xff]   ;;  %v5859_v7 = vld [vmem:[%s7601_s5 + $0x40] sm:$0xff]   ;;  %v5861_v42 = vld [vmem:[%s7601_s5 + $0x48] sm:$0xff]  }
 0x177   : > { %3638 = vmatprep.mubr.bf16.mxu0 %v2786_v45  ;;  %v2746_v59 = vcombine.low %v2738_v53, %v2745_v30  ;;  %v2076_v10 = vshll.u32 %v6957_v62, 16  ;;  %v2079_v55 = vshrl.u32 %v6957_v62, 16  ;;  %v2094_v52 = vsel %vm6426_vm14, %v2087_v6, %v2092_v34  ;;  %v5847_v6 = vld [vmem:[%s7599_s3 + $0x1d0] sm:$0xff]  }
 0x178   : > { %3550 = vmatmul.mubr.bf16.vlgmr.msra.gmra.mrb[16].mxu1 %v2543_v3  ;;  %v2714_v49 = vcombine.low %v2706_v22, %v2713_v56  ;;  %v2070_v37 = vsel %vm6426_vm14, %v2063_v18, %v2068_v8  ;;  %v2791_v31 = vcombine.low %v6706_v19, %v6710_v36  ;;  %v2866_v48 = vrot.slane %v2859_v15, %v6160_v26  ;;  %v5863_v22 = vld [vmem:[%s7601_s5 + $0xc0] sm:$0xff]   ;;  %v5864_v56 = vld [vmem:[%s7601_s5 + $0x50] sm:$0xff]   ;;  %v5868_v15 = vld [vmem:[%s7601_s5 + $0x58] sm:$0xff]  }
 0x179   : > { %v7058_v60 = vrot.slane %v2746_v59, %v6160_v26  ;;  %5506 = vmatpush3.bf16.msra.mxu1 %v5843_v5  ;;  %3557 = vmatprep.mubr.bf16.mxu1 %v2696_v43  ;;  %v2078_v3 = vsel %vm6426_vm14, %v2071_v24, %v2076_v10  ;;  %v2086_v36 = vsel %vm6426_vm14, %v2079_v55, %v2084_v9  ;;  %v5865_v8 = vld [vmem:[%s7601_s5 + $0x80] sm:$0xff]   ;;  %v5867_v24 = vld [vmem:[%s7601_s5 + $0xc8] sm:$0xff]   ;;  %v5866_v59 = vld [vmem:[%s7601_s5 + $0x10] sm:$0xff]  }
 0x17a   : > { %5507 = vmatprep.subr.bf16.mxu1 %v5844_v50  ;;  %v2721_v19 = vrot.slane %v2714_v49, %v6160_v26  ;;  %v2817_v34 = vcombine.low %v2070_v37, %v2078_v3  ;;  %v2792_v40 = vcombine.low %v6957_v62, %v6947_v29  ;;  %v2867_v39 = vcombine.low %v7019_v51, %v2866_v48  ;;  %v5848_v29 = vld [vmem:[%s7599_s3 + $0x190] sm:$0xff]   ;;  %v5862_v50 = vld [vmem:[%s7601_s5 + $0x8] sm:$0xff]   ;;  %v5870_v55 = vld [vmem:[%s7601_s5 + $0x18] sm:$0xff]  }
 0x17b   : > { %v2754_v41 = vcombine.low %v6971_v12, %v7058_v60  ;;  %v2818_v23 = vcombine.low %v2086_v36, %v2094_v52  ;;  %v2799_v57 = vrot.slane %v2791_v31, %v6160_v26  ;;  %v2592_v43 = vcombine.low %v6518_v4, %v6778_v13  ;;  %v5849_v4 = vld [vmem:[%s7599_s3 + $0x1d8] sm:$0xff]   ;;  %5579 = vmatprep.subr.bf16.mxu0 %v5863_v22  ;;  %v5869_v10 = vld [vmem:[%s7601_s5 + $0x88] sm:$0xff]   ;;  %v5871_v37 = vld [vmem:[%s7601_s5 + $0xd0] sm:$0xff]  }
 0x17c   : > { %v2722_v21 = vcombine.low %v6979_v33, %v2721_v19  ;;  %v2825_v38 = vrot.slane %v2817_v34, %v6160_v26  ;;  %v2806_v9 = vrot.slane %v2792_v40, %v6160_v26  ;;  %v5872_v31 = vld [vmem:[%s7601_s5 + $0x60] sm:$0xff]   ;;  %v5875_v36 = vld [vmem:[%s7601_s5 + $0xd8] sm:$0xff]   ;;  %v5876_v34 = vld [vmem:[%s7601_s5 + $0x68] sm:$0xff]  }
 0x17d   : > { %3639 = vmatmul.mubr.bf16.gmra.mrb[40].mxu0 %v2754_v41  ;;  %5508 = vmatpush3.bf16.msra.mxu1 %v5846_v11  ;;  %v2832_v62 = vrot.slane %v2818_v23, %v6160_v26  ;;  %v5874_v3 = vld [vmem:[%s7601_s5 + $0x20] sm:$0xff]   ;;  %v5877_v40 = vld [vmem:[%s7601_s5 + $0x98] sm:$0xff]   ;;  %v5878_v41 = vld [vmem:[%s7601_s5 + $0x28] sm:$0xff]  }
 0x17e   : > { %5679 = vmatprep.mubr.bf16.mxu0 %v2592_v43  ;;  %5509 = vmatprep.subr.bf16.mxu1 %v5847_v6  ;;  %v2807_v13 = vcombine.low %v2799_v57, %v2806_v9  ;;  %v5880_v23 = vld [vmem:[%s7601_s5 + $0x70] sm:$0xff]   ;;  %v5881_v57 = vld [vmem:[%s7601_s5 + $0xa0] sm:$0xff]  }
 0x17f   : > { %v2833_v12 = vcombine.low %v2825_v38, %v2832_v62  ;;  %v5884_v38 = vld [vmem:[%s7601_s5 + $0x78] sm:$0xff]  }
 0x180   : > { %3558 = vmatmul.mubr.bf16.gmra.mrb[20].mxu1 %v2592_v43  ;;  %v2814_v33 = vrot.slane %v2807_v13, %v6160_v26  ;;  %v5882_v43 = vld [vmem:[%s7601_s5 + $0x30] sm:$0xff]  }
 0x181   : > { %5510 = vmatpush3.bf16.msra.mxu1 %v5848_v29  ;;  %3565 = vmatprep.mubr.bf16.mxu1 %v2697_v2  ;;  %v2840_v46 = vrot.slane %v2833_v12, %v6160_v26  ;;  %v5853_v26 = vld [vmem:[%s7599_s3 + $0x1e8] sm:$0xff]   ;;  %v5855_v2 = vld [vmem:[%s7599_s3 + $0x1f0] sm:$0xff]  }
 0x182   : > { %5511 = vmatprep.subr.bf16.mxu1 %v5849_v4  ;;  %v2815_v51 = vcombine.low %v2721_v19, %v2814_v33  ;;  %v5885_v29 = vld [vmem:[%s7601_s5 + $0xa8] sm:$0xff]   ;;  %v5886_v4 = vld [vmem:[%s7601_s5 + $0x38] sm:$0xff]   ;;  %v5887_v13 = vld [vmem:[%s7601_s5 + $0xf0] sm:$0xff]  }
 0x183   : > { %v2841_v14 = vcombine.low %v7058_v60, %v2840_v46  ;;  %v5873_v60 = vld [vmem:[%s7601_s5 + $0x90] sm:$0xff]  }
 0x185   : > { %5680 = vmatmul.mubr.bf16.vlgmr.msra.gmra.mrb[44].mxu0 %v6908_v58  ;;  %5512 = vmatpush3.bf16.msra.mxu1 %v5850_v25  ;;  %v5889_v25 = vld [vmem:[%s7601_s5 + $0x140] sm:$0xff]  }
 0x186   : > { %5683 = vmatprep.mubr.bf16.mxu0 %v7026_v27  ;;  %5513 = vmatprep.subr.bf16.mxu1 %v5851_v0 }
 0x187   : > { %5580 = vmatpush3.bf16.msra.mxu0 %v5865_v8 }
 0x188   : > { %3566 = vmatmul.mubr.bf16.gmra.mrb[24].mxu1 %v6908_v58  ;;  %v5857_v58 = vld [vmem:[%s7599_s3 + $0x1f8] sm:$0xff]   ;;  %5581 = vmatprep.subr.bf16.mxu0 %v5867_v24 }
 0x189   : > { %5514 = vmatpush3.bf16.msra.mxu1 %v5852_v47  ;;  %3573 = vmatprep.mubr.bf16.mxu1 %v2722_v21  ;;  %v5883_v21 = vld [vmem:[%s7601_s5 + $0xe8] sm:$0xff]  }
 0x18a   : > { %5515 = vmatprep.subr.bf16.mxu1 %v5853_v26 }
 0x18b   : > { %5582 = vmatpush3.bf16.msra.mxu0 %v5869_v10 }
 0x18c   : > { %5583 = vmatprep.subr.bf16.mxu0 %v5871_v37 }
 0x18d   : > { %5684 = vmatmul.mubr.bf16.gmra.mrb[48].mxu0 %v2867_v39  ;;  %5516 = vmatpush3.bf16.msra.mxu1 %v5854_v61  ;;  %v5879_v39 = vld [vmem:[%s7601_s5 + $0xe0] sm:$0xff]  }
 0x18e   : > { %5517 = vmatprep.subr.bf16.mxu1 %v5855_v2 }
 0x18f   : > { %5584 = vmatpush3.bf16.msra.mxu0 %v5873_v60 }
 0x190   : > { %3574 = vmatmul.mubr.bf16.gmra.mrb[28].mxu1 %v7026_v27  ;;  %5585 = vmatprep.subr.bf16.mxu0 %v5875_v36 }
 0x191   : > { %5518 = vmatpush3.bf16.msra.mxu1 %v5856_v35  ;;  %3679 = vmatprep.mubr.bf16.mxu1 %v6764_v63  ;;  %v5892_v35 = vld [vmem:[%s7601_s5 + $0xb8] sm:$0xff]  }
 0x192   : > { %5519 = vmatprep.subr.bf16.mxu1 %v5857_v58 }
 0x193   : > { %5586 = vmatpush3.bf16.msra.mxu0 %v5877_v40 }
 0x194   : > { %5587 = vmatprep.subr.bf16.mxu0 %v5879_v39 }
 0x195   : > { %5520 = vmatpush3.bf16.msra.mxu1 %v5858_v20  ;;  %v5895_v20 = vld [vmem:[%s7601_s5 + $0x1c0] sm:$0xff]  }
 0x196   : > { %5557 = vmatprep.subr.bf16.mxu1 %v5859_v7 }
 0x197   : > { %5588 = vmatpush3.bf16.msra.mxu0 %v5881_v57 }
 0x198   : > { %3680 = vmatmul.mubr.bf16.vlgmr.msra.gmra.mrb[32].mxu1 %v6768_v1  ;;  %5589 = vmatprep.subr.bf16.mxu0 %v5883_v21 }
 0x199   : > { %3687 = vmatprep.mubr.bf16.mxu1 %v6883_v32 }
 0x19b   : > { %5590 = vmatpush3.bf16.msra.mxu0 %v5885_v29 }
 0x19c   : > { %5591 = vmatprep.subr.bf16.mxu0 %v5887_v13 }
 0x1a0   : > { %3688 = vmatmul.mubr.bf16.gmra.mrb[36].mxu1 %v6878_v17  ;;  %v5860_v17 = vld [vmem:[%s7601_s5] sm:$0xff]  }
 0x1a1   : > { %3695 = vmatprep.mubr.bf16.mxu1 %v6985_v44  ;;  %5558 = vmatpush3.bf16.msra.mxu1 %v5860_v17 }
 0x1a2   : > { %5559 = vmatprep.subr.bf16.mxu1 %v5861_v42 }
 0x1a5   : > { %5560 = vmatpush3.bf16.msra.mxu1 %v5862_v50 }
 0x1a6   : > { %5561 = vmatprep.subr.bf16.mxu1 %v5864_v56  ;;  %v5170_v56 = vld [vmem:[%s7600_s4] ss:$0 sm:$0xff] }
 0x1a8   : > { %3696 = vmatmul.mubr.bf16.gmra.mrb[40].mxu1 %v6992_v28 }
 0x1a9   : > { %3703 = vmatprep.mubr.bf16.mxu1 %v2841_v14  ;;  %5562 = vmatpush3.bf16.msra.mxu1 %v5866_v59  ;;  %v5891_v14 = vld [vmem:[%s7601_s5 + $0xf8] sm:$0xff]  }
 0x1aa   : > { %5563 = vmatprep.subr.bf16.mxu1 %v5868_v15 }
 0x1ad   : > { %5564 = vmatpush3.bf16.msra.mxu1 %v5870_v55 }
 0x1ae   : > { %5565 = vmatprep.subr.bf16.mxu1 %v5872_v31 }
 0x1b0   : > { %3704 = vmatmul.mubr.bf16.gmra.mrb[44].mxu1 %v2815_v51  ;;  %v5888_v51 = vld [vmem:[%s7601_s5 + $0xb0] sm:$0xff]  }
 0x1b1   : > { %5566 = vmatpush3.bf16.msra.mxu1 %v5874_v3  ;;  %5592 = vmatpush3.bf16.msra.mxu0 %v5888_v51 }
 0x1b2   : > { %5567 = vmatprep.subr.bf16.mxu1 %v5876_v34  ;;  %5593 = vmatprep.subr.bf16.mxu0 %v5891_v14 }
 0x1b5   : > { %5568 = vmatpush3.bf16.msra.mxu1 %v5878_v41  ;;  %5594 = vmatpush3.bf16.msra.mxu0 %v5892_v35 }
 0x1b6   : > { %5569 = vmatprep.subr.bf16.mxu1 %v5880_v23  ;;  %5623 = vmatprep.subr.bf16.mxu0 %v5895_v20 }
 0x1b9   : > { %5570 = vmatpush3.bf16.msra.mxu1 %v5882_v43 }
 0x1ba   : > { %5571 = vmatprep.subr.bf16.mxu1 %v5884_v38 }
 0x1bd   : > { %5572 = vmatpush3.bf16.msra.mxu1 %v5886_v4 }
 0x1be   : > { %5601 = vmatprep.subr.bf16.mxu1 %v5889_v25 }
 0x20f   : > { %v5481_v53 = vpop.f32.mrb[28].mxu0 }
 0x210   : > { %v5482_v63 = vpop.f32.mrb[29].mxu0 }
 0x211   : > { %v7135_v27 = vadd.f32 %v5482_v63, %v5481_v53  ;;  %v5484_v54 = vpop.f32.mrb[30].mxu0  ;;  %v5401_v1 = vpop.f32.mrb[0].mxu1 }
 0x212   : > { %v5485_v45 = vpop.f32.mrb[31].mxu0  ;;  %v5402_v32 = vpop.f32.mrb[1].mxu1 }
 0x213   : > { %v7143_v44 = vadd.f32 %v5485_v45, %v5484_v54  ;;  %v7145_v28 = vadd.f32 %v5402_v32, %v5401_v1  ;;  %v5404_v30 = vpop.f32.mrb[2].mxu1 }
 0x214   : > { %v5405_v5 = vpop.f32.mrb[3].mxu1 }
 0x215   : > { %v7150_v18 = vadd.f32 %v5405_v5, %v5404_v30  ;;  %v3487_v59 = vadd.f32 %v7145_v28, %v5170_v56 }
 0x220   : > { %v5407_v49 = vpop.f32.mrb[4].mxu1 }
 0x221   : > { %v5408_v52 = vpop.f32.mrb[5].mxu1 }
 0x222   : > { %v7188_v11 = vadd.f32 %v5408_v52, %v5407_v49  ;;  %v5410_v48 = vpop.f32.mrb[6].mxu1  ;;  %v3490_v49 = vadd.f32 %v7150_v18, %v5170_v56 }
 0x223   : > { %v5411_v6 = vpop.f32.mrb[7].mxu1 }
 0x224   : > { %v7193_v19 = vadd.f32 %v5411_v6, %v5410_v48  ;;  %v3495_v23 = vadd.f32 %v7188_v11, %v5170_v56 }
 0x226   : > { %v3498_v21 = vadd.f32 %v7193_v19, %v5170_v56 }
 0x22b   : > { %v5487_v9 = vpop.f32.mrb[32].mxu0 }
 0x22c   : > { %v5488_v62 = vpop.f32.mrb[33].mxu0 }
 0x22d   : > { %v7234_v12 = vadd.f32 %v5488_v62, %v5487_v9  ;;  %v5490_v33 = vpop.f32.mrb[34].mxu0 }
 0x22e   : > { %v5491_v46 = vpop.f32.mrb[35].mxu0 }
 0x22f   : > { %v7239_v0 = vadd.f32 %v5491_v46, %v5490_v33 }
 0x231   : > { %v5413_v47 = vpop.f32.mrb[8].mxu1 }
 0x232   : > { %v5414_v26 = vpop.f32.mrb[9].mxu1 }
 0x233   : > { %v5415_v61 = vadd.f32 %v5414_v26, %v5413_v47  ;;  %v5416_v2 = vpop.f32.mrb[10].mxu1 }
 0x234   : > { %v5417_v58 = vpop.f32.mrb[11].mxu1 }
 0x235   : > { %v5418_v53 = vadd.f32 %v5417_v58, %v5416_v2  ;;  %v3503_v11 = vadd.f32 %v5415_v61, %v5170_v56 }
 0x237   : > { %v3506_v26 = vadd.f32 %v5418_v53, %v5170_v56 }
 0x23c   : > { %v5493_v63 = vpop.f32.mrb[36].mxu0 }
 0x23d   : > { %v5494_v54 = vpop.f32.mrb[37].mxu0 }
 0x23e   : > { %v5495_v7 = vadd.f32 %v5494_v54, %v5493_v63  ;;  %v5496_v1 = vpop.f32.mrb[38].mxu0 }
 0x23f   : > { %v5497_v45 = vpop.f32.mrb[39].mxu0 }
 0x240   : > { %v5498_v17 = vadd.f32 %v5497_v45, %v5496_v1 }
 0x243   : > { %v5419_v32 = vpop.f32.mrb[12].mxu1 }
 0x244   : > { %v5420_v30 = vpop.f32.mrb[13].mxu1 }
 0x245   : > { %v5421_v5 = vadd.f32 %v5420_v30, %v5419_v32  ;;  %v5422_v42 = vpop.f32.mrb[14].mxu1 }
 0x246   : > { %v5423_v50 = vpop.f32.mrb[15].mxu1 }
 0x247   : > { %v5424_v22 = vadd.f32 %v5423_v50, %v5422_v42  ;;  %v3511_v45 = vadd.f32 %v5421_v5, %v5170_v56 }
 0x249   : > { %v3514_v42 = vadd.f32 %v5424_v22, %v5170_v56 }
 0x24b   : > { %v5441_v8 = vpop.f32.mrb[16].mxu1 }
 0x24c   : > { %v5442_v24 = vpop.f32.mrb[17].mxu1 }
 0x24d   : > { %v5443_v15 = vadd.f32 %v5442_v24, %v5441_v8  ;;  %v5444_v10 = vpop.f32.mrb[18].mxu1 }
 0x24e   : > { %v5445_v55 = vpop.f32.mrb[19].mxu1 }
 0x24f   : > { %v3552_v37 = vadd.f32 %v5443_v15, %v3487_v59  ;;  %v5446_v52 = vadd.f32 %v5445_v55, %v5444_v10 }
 0x250   : > { %v5499_v31 = vpop.f32.mrb[40].mxu0 }
 0x251   : > { %v5500_v60 = vpop.f32.mrb[41].mxu0  ;;  %v3555_v48 = vadd.f32 %v5446_v52, %v3490_v49  ;;  %v3617_v3 = vadd.f32 %v7135_v27, %v3552_v37  ;;  %v6004_v37 = vmov 1983009808  }
 0x252   : > { %v5501_v6 = vadd.f32 %v5500_v60, %v5499_v31  ;;  %v5502_v36 = vpop.f32.mrb[42].mxu0 }
 0x253   : > { %v5503_v34 = vpop.f32.mrb[43].mxu0  ;;  %v5447_v40 = vpop.f32.mrb[20].mxu1  ;;  %v3620_v41 = vadd.f32 %v7143_v44, %v3555_v48 }
 0x254   : > { %v5504_v39 = vadd.f32 %v5503_v34, %v5502_v36  ;;  %v5448_v28 = vpop.f32.mrb[21].mxu1 }
 0x255   : > { %v5449_v57 = vadd.f32 %v5448_v28, %v5447_v40  ;;  %v5450_v43 = vpop.f32.mrb[22].mxu1 }
 0x256   : > { %v5451_v18 = vpop.f32.mrb[23].mxu1 }
 0x257   : > { %v3560_v38 = vadd.f32 %v5449_v57, %v3495_v23  ;;  %v5452_v9 = vadd.f32 %v5451_v18, %v5450_v43 }
 0x258   : > { %v5681_v29 = vpop.f32.mrb[44].mxu0 }
 0x259   : > { %v3746_v62 = vpop.f32.mrb[45].mxu0  ;;  %v3563_v27 = vadd.f32 %v5452_v9, %v3498_v21  ;;  %v3625_v4 = vadd.f32 %v7234_v12, %v3560_v38 }
 0x25a   : > { %v7263_v13 = vpop.f32.mrb[46].mxu0 }
 0x25b   : > { %v3749_v33 = vpop.f32.mrb[47].mxu0  ;;  %v5453_v44 = vpop.f32.mrb[24].mxu1  ;;  %v3628_v25 = vadd.f32 %v7239_v0, %v3563_v27 }
 0x25c   : > { %v5454_v46 = vpop.f32.mrb[25].mxu1 }
 0x25d   : > { %v5455_v51 = vadd.f32 %v5454_v46, %v5453_v44  ;;  %v5456_v14 = vpop.f32.mrb[26].mxu1 }
 0x25e   : > { %v5457_v47 = vpop.f32.mrb[27].mxu1 }
 0x25f   : > { %v3568_v19 = vadd.f32 %v5455_v51, %v3503_v11  ;;  %v5458_v2 = vadd.f32 %v5457_v47, %v5456_v14 }
 0x260   : > { %v7266_v35 = vpop.f32.mrb[48].mxu0 }
 0x261   : > { %v7268_v58 = vpop.f32.mrb[49].mxu0  ;;  %v3571_v20 = vadd.f32 %v5458_v2, %v3506_v26  ;;  %v7270_v12 = vadd.f32 %v5495_v7, %v3568_v19 }
 0x262   : > { %v7272_v63 = vpop.f32.mrb[50].mxu0 }
 0x263   : > { %v7274_v54 = vpop.f32.mrb[51].mxu0  ;;  %v5459_v0 = vpop.f32.mrb[28].mxu1  ;;  %v7276_v1 = vadd.f32 %v5498_v17, %v3571_v20  ;;  %v3795_v17 = vunpack.c.l.s4 %v6004_v37 }
 0x264   : > { %v5460_v61 = vpop.f32.mrb[29].mxu1 }
 0x265   : > { %v5461_v32 = vadd.f32 %v5460_v61, %v5459_v0  ;;  %v5462_v53 = vpop.f32.mrb[30].mxu1  ;;  %v3796_v36 = vunpack.c.0.s8 %v3795_v17 }
 0x266   : > { %v5463_v30 = vpop.f32.mrb[31].mxu1 }
 0x267   : > { %v3576_v50 = vadd.f32 %v5461_v32, %v3511_v45  ;;  %v5464_v8 = vadd.f32 %v5463_v30, %v5462_v53  ;;  %v7283_v28 = vsub.s32 %v3796_v36, %v6148_v16 }
 0x269   : > { %v3579_v24 = vadd.f32 %v5464_v8, %v3514_v42  ;;  %v7278_v59 = vadd.f32 %v5501_v6, %v3576_v50 }
 0x26b   : > { %v5521_v7 = vpop.f32.mrb[32].mxu1  ;;  %v7280_v15 = vadd.f32 %v5504_v39, %v3579_v24 }
 0x26c   : > { %v5522_v10 = vpop.f32.mrb[33].mxu1 }
 0x26d   : > { %v5523_v55 = vadd.f32 %v5522_v10, %v5521_v7  ;;  %v5524_v49 = vpop.f32.mrb[34].mxu1 }
 0x26e   : > { %v5525_v52 = vpop.f32.mrb[35].mxu1 }
 0x26f   : > { %v3682_v31 = vadd.f32 %v5523_v55, %v3617_v3  ;;  %v5526_v5 = vadd.f32 %v5525_v52, %v5524_v49 }
 0x271   : > { %v3747_v60 = vadd.f32 %v3746_v62, %v3682_v31  ;;  %v3685_v48 = vadd.f32 %v5526_v5, %v3620_v41 }
 0x273   : > { %v3750_v22 = vadd.f32 %v3749_v33, %v3685_v48  ;;  %v5527_v56 = vpop.f32.mrb[36].mxu1  ;;  %v3777_v40 = vmax.f32 %v3747_v60, 0.0 }
 0x274   : > { %v5528_v34 = vpop.f32.mrb[37].mxu1 }
 0x275   : > { %v3778_v6 = vmax.f32 %v3750_v22, 0.0  ;;  %v5529_v39 = vadd.f32 %v5528_v34, %v5527_v56  ;;  %v5530_v23 = vpop.f32.mrb[38].mxu1 }
 0x276   : > { %v5531_v57 = vpop.f32.mrb[39].mxu1 }
 0x277   : > { %v3785_v43 = vmax.f32 %v3777_v40, %v3778_v6  ;;  %v3690_v18 = vadd.f32 %v5529_v39, %v3625_v4  ;;  %v5532_v21 = vadd.f32 %v5531_v57, %v5530_v23 }
 0x279   : > { %v3793_v3 = vcombine.high %v3785_v43, %v3785_v43  ;;  %v3800_v38 = vrot.slane %v3785_v43, %v7283_v28  ;;  %v3755_v41 = vadd.f32 %v5681_v29, %v3690_v18  ;;  %v3693_v9 = vadd.f32 %v5532_v21, %v3628_v25 }
 0x27b   : > { %v3807_v62 = vrot.slane %v3793_v3, %v7283_v28  ;;  %v3808_v27 = vcombine.high %v3800_v38, %v3800_v38  ;;  %v3878_v33 = vsel %vm3877_vm15, %v3800_v38, -inf  ;;  %v5533_v44 = vpop.f32.mrb[40].mxu1  ;;  %v3758_v46 = vadd.f32 %v7263_v13, %v3693_v9 }
 0x27c   : > { %v3879_v16 = vrot.slane %v3878_v33, 4  ;;  %v5534_v11 = vpop.f32.mrb[41].mxu1  ;;  %v3779_v61 = vmax.f32 %v3755_v41, 0.0 }
 0x27d   : > { %v3809_v51 = vcombine.high %v3807_v62, %v3807_v62  ;;  %v3885_v4 = vsel %vm3877_vm15, %v3808_v27, -inf  ;;  %v3892_v14 = vsel %vm3877_vm15, %v3807_v62, -inf  ;;  %v5535_v47 = vadd.f32 %v5534_v11, %v5533_v44  ;;  %v5536_v26 = vpop.f32.mrb[42].mxu1 }
 0x27e   : > { %v3880_v19 = vmax.f32 %v3878_v33, %v3879_v16  ;;  %v3886_v29 = vrot.slane %v3885_v4, 4  ;;  %v3893_v25 = vrot.slane %v3892_v14, 4  ;;  %v3780_v2 = vmax.f32 %v3758_v46, 0.0  ;;  %v5537_v20 = vpop.f32.mrb[43].mxu1 }
 0x27f   : > { %v3899_v0 = vsel %vm3877_vm15, %v3809_v51, -inf  ;;  %v3698_v45 = vadd.f32 %v5535_v47, %v7270_v12  ;;  %v5538_v32 = vadd.f32 %v5537_v20, %v5536_v26 }
 0x280   : > { %v3881_v13 = vrot.slane %v3880_v19, 2  ;;  %v3887_v53 = vmax.f32 %v3885_v4, %v3886_v29  ;;  %v3894_v30 = vmax.f32 %v3892_v14, %v3893_v25  ;;  %v3900_v42 = vrot.slane %v3899_v0, 4 }
 0x281   : > { %v3786_v50 = vmax.f32 %v3779_v61, %v3780_v2  ;;  %v3763_v8 = vadd.f32 %v7268_v58, %v3698_v45  ;;  %v3701_v24 = vadd.f32 %v5538_v32, %v7276_v1 }
 0x282   : > { %v3882_v7 = vmax.f32 %v3880_v19, %v3881_v13  ;;  %v3888_v10 = vrot.slane %v3887_v53, 2  ;;  %v3895_v55 = vrot.slane %v3894_v30, 2  ;;  %v3901_v49 = vmax.f32 %v3899_v0, %v3900_v42 }
 0x283   : > { %v3810_v37 = vcombine.high %v3786_v50, %v3786_v50  ;;  %v3817_v17 = vrot.slane %v3786_v50, %v7283_v28  ;;  %v3781_v52 = vmax.f32 %v3763_v8, 0.0  ;;  %v3766_v12 = vadd.f32 %v7274_v54, %v3701_v24  ;;  %v5539_v31 = vpop.f32.mrb[44].mxu1 }
 0x284   : > { %v3883_v5 = vrot.slane %v3882_v7, 1  ;;  %v7297_v60 = vmax.f32 %v3887_v53, %v3888_v10  ;;  %v7299_v48 = vmax.f32 %v3894_v30, %v3895_v55  ;;  %v3902_v36 = vrot.slane %v3901_v49, 2  ;;  %v5540_v58 = vpop.f32.mrb[45].mxu1 }
 0x285   : > { %v3824_v1 = vrot.slane %v3810_v37, %v7283_v28  ;;  %v3825_v22 = vcombine.high %v3817_v17, %v3817_v17  ;;  %v3906_v56 = vsel %vm3877_vm15, %v3817_v17, -inf  ;;  %v3782_v34 = vmax.f32 %v3766_v12, 0.0  ;;  %v5542_v40 = vpop.f32.mrb[46].mxu1 }
 0x286   : > { %v3884_v6 = vmax.f32 %v3882_v7, %v3883_v5  ;;  %v3903_v39 = vmax.f32 %v3901_v49, %v3902_v36  ;;  %v3907_v23 = vrot.slane %v3906_v56, 4  ;;  %v5541_v57 = vadd.f32 %v5540_v58, %v5539_v31  ;;  %v5543_v54 = vpop.f32.mrb[47].mxu1 }
 0x287   : > { %v3826_v43 = vcombine.high %v3824_v1, %v3824_v1  ;;  %v3913_v18 = vsel %vm3877_vm15, %v3825_v22, -inf  ;;  %v3920_v21 = vsel %vm3877_vm15, %v3824_v1, -inf  ;;  %v3787_v3 = vmax.f32 %v3781_v52, %v3782_v34 }
 0x288   : > { %v3904_v38 = vrot.slane %v3903_v39, 1  ;;  %v3990_v41 = vpack.c.bf16 %v3884_v6, %v3884_v6  ;;  %v3908_v9 = vmax.f32 %v3906_v56, %v3907_v23  ;;  %v3914_v62 = vrot.slane %v3913_v18, 4 }
 0x289   : > { %v3921_v27 = vrot.slane %v3920_v21, 4  ;;  %v3927_v33 = vsel %vm3877_vm15, %v3826_v43, -inf  ;;  %v3827_v44 = vcombine.high %v3787_v3, %v3787_v3  ;;  %v3834_v16 = vrot.slane %v3787_v3, %v7283_v28 }
 0x28a   : > { %v3905_v46 = vmax.f32 %v3903_v39, %v3904_v38  ;;  %v7307_v11 = vunpack.c.l.b16 %v3990_v41  ;;  %v3909_v51 = vrot.slane %v3908_v9, 2  ;;  %v3915_v4 = vmax.f32 %v3913_v18, %v3914_v62 }
 0x28b   : > { %v3922_v14 = vmax.f32 %v3920_v21, %v3921_v27  ;;  %v3928_v47 = vrot.slane %v3927_v33, 4  ;;  %v7310_v26 = vrot.slane %v3827_v44, %v7283_v28  ;;  %v3842_v19 = vcombine.high %v3834_v16, %v3834_v16 }
 0x28c   : > { %v3993_v29 = vpack.c.bf16 %v3905_v46, %v3905_v46  ;;  %v3910_v25 = vmax.f32 %v3908_v9, %v3909_v51  ;;  %v3916_v2 = vrot.slane %v3915_v4, 2  ;;  %v3934_v20 = vsel %vm3877_vm15, %v3834_v16, -inf }
 0x28d   : > { %v3923_v0 = vrot.slane %v3922_v14, 2  ;;  %v3929_v61 = vmax.f32 %v3927_v33, %v3928_v47  ;;  %v3843_v45 = vcombine.high %v7310_v26, %v7310_v26  ;;  %v3935_v32 = vrot.slane %v3934_v20, 4 }
 0x28e   : > { %v7315_v13 = vunpack.c.l.b16 %v3993_v29  ;;  %v3911_v53 = vrot.slane %v3910_v25, 1  ;;  %v3917_v30 = vmax.f32 %v3915_v4, %v3916_v2  ;;  %v3941_v42 = vsel %vm3877_vm15, %v3842_v19, -inf }
 0x28f   : > { %v3930_v50 = vrot.slane %v3929_v61, 2  ;;  %v3936_v8 = vmax.f32 %v3934_v20, %v3935_v32  ;;  %v3942_v24 = vrot.slane %v3941_v42, 4  ;;  %v3948_v7 = vsel %vm3877_vm15, %v7310_v26, -inf }
 0x290   : > { %v3912_v10 = vmax.f32 %v3910_v25, %v3911_v53  ;;  %v3949_v55 = vrot.slane %v3948_v7, 4  ;;  %v3706_v49 = vadd.f32 %v5541_v57, %v7278_v59  ;;  %v5544_v37 = vadd.f32 %v5543_v54, %v5542_v40 }
 0x291   : > { %v7321_v17 = vmax.f32 %v3929_v61, %v3930_v50  ;;  %v3937_v52 = vrot.slane %v3936_v8, 2  ;;  %v3943_v12 = vmax.f32 %v3941_v42, %v3942_v24  ;;  %v3890_v31 = vrot.slane %v7297_v60, 1 }
 0x292   : > { %v3994_v5 = vpack.c.bf16 %v3912_v10, %v3912_v10  ;;  %v3950_v36 = vmax.f32 %v3948_v7, %v3949_v55  ;;  %v3771_v58 = vadd.f32 %v7266_v35, %v3706_v49  ;;  %v3709_v1 = vadd.f32 %v5544_v37, %v7280_v15 }
 0x293   : > { %v3944_v22 = vrot.slane %v3943_v12, 2  ;;  %v3891_v56 = vmax.f32 %v7297_v60, %v3890_v31  ;;  %v3897_v34 = vrot.slane %v7299_v48, 1  ;;  %v3918_v59 = vrot.slane %v3917_v30, 1  ;;  %v5890_v31 = vld [vmem:[%s7601_s5 + $0x100] sm:$0xff]  }
 0x294   : > { %v4012_v40 = vunpack.c.l.b16 %v3994_v5  ;;  %v3951_v6 = vrot.slane %v3950_v36, 2  ;;  %v3783_v39 = vmax.f32 %v3771_v58, 0.0  ;;  %v3774_v23 = vadd.f32 %v7272_v63, %v3709_v1 }
 0x295   : > { %v3898_v57 = vmax.f32 %v7299_v48, %v3897_v34  ;;  %v3919_v54 = vmax.f32 %v3917_v30, %v3918_v59  ;;  %v3924_v43 = vmax.f32 %v3922_v14, %v3923_v0  ;;  %v3991_v18 = vpack.c.bf16 %v3891_v56, %v3891_v56  ;;  %v5893_v56 = vld [vmem:[%s7601_s5 + $0x148] sm:$0xff]  }
 0x296   : > { %v7330_v21 = vmax.f32 %v3950_v36, %v3951_v6  ;;  %v3784_v35 = vmax.f32 %v3774_v23, 0.0  ;;  %v3938_v15 = vmax.f32 %v3936_v8, %v3937_v52  ;;  %v3945_v3 = vmax.f32 %v3943_v12, %v3944_v22 }
 0x297   : > { %v3925_v38 = vrot.slane %v3924_v43, 1  ;;  %v3992_v60 = vpack.c.bf16 %v3898_v57, %v3898_v57  ;;  %v3995_v41 = vpack.c.bf16 %v3919_v54, %v3919_v54  ;;  %v4011_v9 = vunpack.c.l.b16 %v3991_v18 }
 0x298   : > { %v3788_v62 = vmax.f32 %v3783_v39, %v3784_v35  ;;  %v3939_v27 = vrot.slane %v3938_v15, 1  ;;  %v3946_v33 = vrot.slane %v3945_v3, 1  ;;  %v3932_v44 = vrot.slane %v7321_v17, 1 }
 0x299   : > { %v3926_v63 = vmax.f32 %v3924_v43, %v3925_v38  ;;  %v7333_v16 = vunpack.c.l.b16 %v3995_v41  ;;  %v4024_v48 = vunpack.c.l.b16 %v3992_v60  ;;  %v4015_v46 = vsel %vm4014_vm0, %v4011_v9, %v7307_v11 }
 0x29a   : > { %v3844_v51 = vcombine.high %v3788_v62, %v3788_v62  ;;  %v3851_v4 = vrot.slane %v3788_v62, %v7283_v28  ;;  %v4017_v14 = vsel %vm4016_vm1, %v4012_v40, %v4015_v46  ;;  %v3940_v47 = vmax.f32 %v3938_v15, %v3939_v27  ;;  %v5898_v46 = vld [vmem:[%s7601_s5 + $0x110] sm:$0xff]  }
 0x29b   : > { %v3996_v19 = vpack.c.bf16 %v3926_v63, %v3926_v63  ;;  %v4026_v29 = vsel %vm4014_vm0, %v4024_v48, %v4011_v9  ;;  %v4019_v25 = vsel %vm4018_vm2, %v7333_v16, %v4017_v14  ;;  %v3947_v2 = vmax.f32 %v3945_v3, %v3946_v33  ;;  %v5896_v3 = vld [vmem:[%s7601_s5 + $0x150] sm:$0xff]  }
 0x29c   : > { %v3858_v20 = vrot.slane %v3844_v51, %v7283_v28  ;;  %v3859_v0 = vcombine.high %v3851_v4, %v3851_v4  ;;  %v3962_v61 = vsel %vm3877_vm15, %v3851_v4, -inf  ;;  %v4027_v11 = vsel %vm4016_vm1, %v7333_v16, %v4026_v29  ;;  %v5900_v29 = vld [vmem:[%s7601_s5 + $0x158] sm:$0xff]  }
 0x29d   : > { %v3963_v32 = vrot.slane %v3962_v61, 4  ;;  %v4025_v53 = vunpack.c.l.b16 %v3996_v19  ;;  %v4020_v30 = vpack.c.b16 %v4019_v25, %v4019_v25  ;;  %v3998_v42 = vpack.c.bf16 %v3940_v47, %v3940_v47  ;;  %v5899_v19 = vld [vmem:[%s7601_s5 + $0x1c8] sm:$0xff]  }
 0x29e   : > { %v3860_v50 = vcombine.high %v3858_v20, %v3858_v20  ;;  %v3969_v8 = vsel %vm3877_vm15, %v3859_v0, -inf  ;;  %v3976_v24 = vsel %vm3877_vm15, %v3858_v20, -inf  ;;  %v3999_v7 = vpack.c.bf16 %v3947_v2, %v3947_v2 }
 0x29f   : > { %v3964_v10 = vmax.f32 %v3962_v61, %v3963_v32  ;;  %v3970_v55 = vrot.slane %v3969_v8, 4  ;;  %v3977_v49 = vrot.slane %v3976_v24, 4  ;;  %v4028_v37 = vsel %vm4018_vm2, %v4025_v53, %v4027_v11 }
 0x2a0   : > { %v3983_v52 = vsel %vm3877_vm15, %v3860_v50, -inf  ;;  %v4029_v12 = vpack.c.b16 %v4028_v37, %v4028_v37  ;;  %v7353_v5 = vunpack.c.l.b16 %v3998_v42  ;;  %v7355_v36 = vunpack.c.l.b16 %v3999_v7  ;;  %v5902_v42 = vld [vmem:[%s7601_s5 + $0x118] sm:$0xff]   ;;  %v5903_v7 = vld [vmem:[%s7601_s5 + $0x1d0] sm:$0xff]  }
 0x2a1   : > { %v3965_v58 = vrot.slane %v3964_v10, 2  ;;  %v3971_v1 = vmax.f32 %v3969_v8, %v3970_v55  ;;  %v3984_v22 = vrot.slane %v3983_v52, 4  ;;  %v4044_v34 = vsel %vm4014_vm0, %v7333_v16, %v4012_v40  ;;  %v5894_v40 = vld [vmem:[%s7601_s5 + $0x108] sm:$0xff]  }
 0x2a2   : > { %4701 = vmatprep.mubr.bf16.mxu1 %v4029_v12  ;;  %v4045_v59 = vsel %vm4016_vm1, %v7353_v5, %v4044_v34  ;;  %v3933_v6 = vmax.f32 %v7321_v17, %v3932_v44  ;;  %v4035_v39 = vsel %vm4014_vm0, %v7315_v13, %v4024_v48  ;;  %v3953_v23 = vrot.slane %v7330_v21, 1  ;;  %v5897_v48 = vld [vmem:[%s7601_s5 + $0x180] sm:$0xff]  }
 0x2a3   : > { %v3966_v57 = vmax.f32 %v3964_v10, %v3965_v58  ;;  %4702 = vmatmul.mubr.bf16.vlgmr.msra.gmra.mrb[48].mxu1 %v4020_v30  ;;  %v4046_v54 = vsel %vm4018_vm2, %v7355_v36, %v4045_v59  ;;  %v4036_v43 = vsel %vm4016_vm1, %v4025_v53, %v4035_v39  ;;  %v3955_v13 = vsel %vm3877_vm15, %v3843_v45, -inf  ;;  %v5901_v30 = vld [vmem:[%s7601_s5 + $0x188] sm:$0xff]   ;;  %v5904_v10 = vld [vmem:[%s7601_s5 + $0x160] sm:$0xff]  }
 0x2a4   : > { %5602 = vmatpush3.bf16.msra.mxu1 %v5890_v31  ;;  %v4047_v18 = vpack.c.b16 %v4046_v54, %v4046_v54  ;;  %v3997_v35 = vpack.c.bf16 %v3933_v6, %v3933_v6  ;;  %v3954_v17 = vmax.f32 %v7330_v21, %v3953_v23  ;;  %v3956_v38 = vrot.slane %v3955_v13, 4  ;;  %v5907_v23 = vld [vmem:[%s7601_s5 + $0x1d8] sm:$0xff]  }
 0x2a5   : > { %v3967_v15 = vrot.slane %v3966_v57, 1  ;;  %5603 = vmatprep.subr.bf16.mxu1 %v5893_v56  ;;  %v3972_v60 = vrot.slane %v3971_v1, 2  ;;  %v3978_v41 = vmax.f32 %v3976_v24, %v3977_v49  ;;  %v3985_v9 = vmax.f32 %v3983_v52, %v3984_v22  ;;  %v5905_v22 = vld [vmem:[%s7601_s5 + $0x190] sm:$0xff]  }
 0x2a6   : > { %4741 = vmatprep.mubr.bf16.mxu0 %v4047_v18  ;;  %v4034_v62 = vunpack.c.l.b16 %v3997_v35  ;;  %v4000_v27 = vpack.c.bf16 %v3954_v17, %v3954_v17  ;;  %v4051_v21 = vsel %vm4014_vm0, %v4025_v53, %v7333_v16  ;;  %v3957_v33 = vmax.f32 %v3955_v13, %v3956_v38  ;;  %v5909_v35 = vld [vmem:[%s7601_s5 + $0x198] sm:$0xff]  }
 0x2a7   : > { %v3973_v26 = vmax.f32 %v3971_v1, %v3972_v60  ;;  %v3979_v44 = vrot.slane %v3978_v41, 2  ;;  %v4052_v45 = vsel %vm4016_vm1, %v7355_v36, %v4051_v21  ;;  %v3968_v4 = vmax.f32 %v3966_v57, %v3967_v15  ;;  %v5908_v57 = vld [vmem:[%s7601_s5 + $0x168] sm:$0xff]  }
 0x2a8   : > { %5604 = vmatpush3.bf16.msra.mxu1 %v5894_v40  ;;  %v4037_v63 = vsel %vm4018_vm2, %v4034_v62, %v4036_v43  ;;  %v7393_v51 = vunpack.c.l.b16 %v4000_v27  ;;  %v4058_v16 = vsel %vm4014_vm0, %v4034_v62, %v4025_v53  ;;  %v3958_v47 = vrot.slane %v3957_v33, 2  ;;  %v5910_v15 = vld [vmem:[%s7601_s5 + $0x128] sm:$0xff]   ;;  %v5913_v27 = vld [vmem:[%s7601_s5 + $0x1a0] sm:$0xff]  }
 0x2a9   : > { %v4038_v14 = vpack.c.b16 %v4037_v63, %v4037_v63  ;;  %5605 = vmatprep.subr.bf16.mxu1 %v5896_v3  ;;  %v3974_v25 = vrot.slane %v3973_v26, 1  ;;  %v3980_v2 = vmax.f32 %v3978_v41, %v3979_v44  ;;  %v4002_v61 = vpack.c.bf16 %v3968_v4, %v3968_v4  ;;  %v5911_v3 = vld [vmem:[%s7601_s5 + $0x1e0] sm:$0xff]   ;;  %v5912_v41 = vld [vmem:[%s7601_s5 + $0x170] sm:$0xff]   ;;  %v5916_v44 = vld [vmem:[%s7601_s5 + $0x178] sm:$0xff]  }
 0x2aa   : > { %v4059_v20 = vsel %vm4016_vm1, %v7393_v51, %v4058_v16  ;;  %v7406_v0 = vsel %vm4018_vm2, %v7393_v51, %v4052_v45  ;;  %v3959_v11 = vmax.f32 %v3957_v33, %v3958_v47  ;;  %v3986_v8 = vrot.slane %v3985_v9, 2  ;;  %v5914_v33 = vld [vmem:[%s7601_s5 + $0x130] sm:$0xff]   ;;  %v5917_v45 = vld [vmem:[%s7601_s5 + $0x1a8] sm:$0xff]   ;;  %v5918_v63 = vld [vmem:[%s7601_s5 + $0x138] sm:$0xff]  }
 0x2ab   : > { %4742 = vmatmul.mubr.bf16.vlgmr.msra.gmra.mrb[52].mxu0 %v4038_v14  ;;  %v3975_v32 = vmax.f32 %v3973_v26, %v3974_v25  ;;  %v3981_v53 = vrot.slane %v3980_v2, 1  ;;  %v4065_v50 = vunpack.c.l.b16 %v4002_v61  ;;  %v4067_v37 = vsel %vm4014_vm0, %v7355_v36, %v7353_v5  ;;  %v5906_v5 = vld [vmem:[%s7601_s5 + $0x120] sm:$0xff]   ;;  %v5915_v26 = vld [vmem:[%s7601_s5 + $0x1e8] sm:$0xff]   ;;  %v5922_v16 = vld [vmem:[%s7601_s5 + $0x1f8] sm:$0xff]  }
 0x2ac   : > { %5624 = vmatpush3.bf16.msra.mxu0 %v5897_v48  ;;  %5606 = vmatpush3.bf16.msra.mxu1 %v5898_v46  ;;  %v3960_v24 = vrot.slane %v3959_v11, 1  ;;  %v3987_v12 = vmax.f32 %v3985_v9, %v3986_v8  ;;  %v4074_v56 = vsel %vm4014_vm0, %v7393_v51, %v7355_v36  ;;  %v5919_v48 = vld [vmem:[%s7601_s5 + $0x1f0] sm:$0xff]   ;;  %v4054_v4 = vpack.c.b16 %v7406_v0, %v7406_v0  ;;  %v5923_v47 = vld [vmem:[%s7601_s5 + $0x1b8] sm:$0xff]   ;;  %v5928_v0 = vld [vmem:[%s7601_s5 + $0x228] sm:$0xff]  }
 0x2ad   : > { %5625 = vmatprep.subr.bf16.mxu0 %v5899_v19  ;;  %5607 = vmatprep.subr.bf16.mxu1 %v5900_v29  ;;  %v3982_v55 = vmax.f32 %v3980_v2, %v3981_v53  ;;  %v4003_v49 = vpack.c.bf16 %v3975_v32, %v3975_v32  ;;  %v4068_v52 = vsel %vm4016_vm1, %v4065_v50, %v4067_v37  ;;  %v5920_v46 = vld [vmem:[%s7601_s5 + $0x1b0] sm:$0xff]   ;;  %v6005_v14 = vmov 0.0   ;;  %v5924_v19 = vld [vmem:[%s7601_s5 + $0x208] sm:$0xff]   ;;  %v5926_v2 = vld [vmem:[%s7601_s5 + $0x218] sm:$0xff]  }
 0x2ae   : > { %v3961_v31 = vmax.f32 %v3959_v11, %v3960_v24  ;;  %v3988_v34 = vrot.slane %v3987_v12, 1  ;;  %v5925_v25 = vld [vmem:[%s7601_s5 + $0x210] sm:$0xff]   ;;  %v5930_v11 = vld [vmem:[%s7601_s5 + $0x238] sm:$0xff]   ;;  %v5931_v53 = vld [vmem:[%s7603_s7] sm:$0xff]  }
 0x2af   : > { %v4004_v58 = vpack.c.bf16 %v3982_v55, %v3982_v55  ;;  %v4066_v1 = vunpack.c.l.b16 %v4003_v49  ;;  %v5929_v61 = vld [vmem:[%s7601_s5 + $0x230] sm:$0xff]   ;;  %v5934_v50 = vld [vmem:[%s7603_s7 + $0x18] sm:$0xff]   ;;  %v5935_v8 = vld [vmem:[%s7603_s7 + $0x20] sm:$0xff]  }
 0x2b0   : > { %5626 = vmatpush3.bf16.msra.mxu0 %v5901_v30  ;;  %5608 = vmatpush3.bf16.msra.mxu1 %v5902_v42  ;;  %v4001_v59 = vpack.c.bf16 %v3961_v31, %v3961_v31  ;;  %v3989_v54 = vmax.f32 %v3987_v12, %v3988_v34  ;;  %v5932_v30 = vld [vmem:[%s7603_s7 + $0x8] sm:$0xff]   ;;  %v5933_v42 = vld [vmem:[%s7603_s7 + $0x10] sm:$0xff]   ;;  %v5243_v31 = vld [vmem:[%s7602_s6] ss:$0 sm:$0xff] }
 0x2b1   : > { %5627 = vmatprep.subr.bf16.mxu0 %v5903_v7  ;;  %5609 = vmatprep.subr.bf16.mxu1 %v5904_v10  ;;  %v4073_v6 = vunpack.c.l.b16 %v4004_v58  ;;  %v4075_v39 = vsel %vm4016_vm1, %v4066_v1, %v4074_v56  ;;  %v4069_v36 = vsel %vm4018_vm2, %v4066_v1, %v4068_v52  ;;  %v5936_v24 = vld [vmem:[%s7603_s7 + $0x28] sm:$0xff]   ;;  %v5937_v7 = vld [vmem:[%s7603_s7 + $0x30] sm:$0xff]   ;;  %v5938_v10 = vld [vmem:[%s7603_s7 + $0x38] sm:$0xff]  }
 0x2b2   : > { %v4057_v43 = vunpack.c.l.b16 %v4001_v59  ;;  %v4005_v17 = vpack.c.bf16 %v3989_v54, %v3989_v54  ;;  %v4070_v29 = vpack.c.b16 %v4069_v36, %v4069_v36 }
 0x2b3   : > { %v4076_v40 = vsel %vm4018_vm2, %v4073_v6, %v4075_v39 }
 0x2b4   : > { %5628 = vmatpush3.bf16.msra.mxu0 %v5905_v22  ;;  %v4077_v18 = vpack.c.b16 %v4076_v40, %v4076_v40  ;;  %5610 = vmatpush3.bf16.msra.mxu1 %v5906_v5  ;;  %v4060_v13 = vsel %vm4018_vm2, %v4057_v43, %v4059_v20  ;;  %v4081_v38 = vsel %vm4014_vm0, %v4057_v43, %v7393_v51  ;;  %v4080_v9 = vunpack.c.l.b16 %v4005_v17  ;;  %v5921_v51 = vld [vmem:[%s7601_s5 + $0x200] sm:$0xff]  }
 0x2b5   : > { %5629 = vmatprep.subr.bf16.mxu0 %v5907_v23  ;;  %5611 = vmatprep.subr.bf16.mxu1 %v5908_v57  ;;  %v4061_v60 = vpack.c.b16 %v4060_v13, %v4060_v13  ;;  %v4082_v62 = vsel %vm4016_vm1, %v4073_v6, %v4081_v38  ;;  %v5927_v20 = vld [vmem:[%s7601_s5 + $0x220] sm:$0xff]  }
 0x2b6   : > { %4821 = vmatprep.mubr.bf16.mxu0 %v4077_v18  ;;  %v4083_v21 = vsel %vm4018_vm2, %v4080_v9, %v4082_v62 }
 0x2b7   : > { %4781 = vmatprep.mubr.bf16.mxu1 %v4061_v60  ;;  %v4084_v32 = vpack.c.b16 %v4083_v21, %v4083_v21 }
 0x2b8   : > { %5630 = vmatpush3.bf16.msra.mxu0 %v5909_v35  ;;  %5612 = vmatpush3.bf16.msra.mxu1 %v5910_v15 }
 0x2b9   : > { %5631 = vmatprep.subr.bf16.mxu0 %v5911_v3  ;;  %5613 = vmatprep.subr.bf16.mxu1 %v5912_v41 }
 0x2bc   : > { %5632 = vmatpush3.bf16.msra.mxu0 %v5913_v27  ;;  %5614 = vmatpush3.bf16.msra.mxu1 %v5914_v33 }
 0x2bd   : > { %5633 = vmatprep.subr.bf16.mxu0 %v5915_v26  ;;  %5615 = vmatprep.subr.bf16.mxu1 %v5916_v44 }
 0x2c0   : > { %5634 = vmatpush3.bf16.msra.mxu0 %v5917_v45  ;;  %5616 = vmatpush3.bf16.msra.mxu1 %v5918_v63 }
 0x2c1   : > { %5635 = vmatprep.subr.bf16.mxu0 %v5919_v48  ;;  %5687 = vmatprep.subr.bf16.mxu1 %v6005_v14 }
 0x2c3   : > { %4782 = vmatmul.mubr.bf16.vlgmr.msra.gmra.mrb[52].mxu1 %v4054_v4 }
 0x2c4   : > { %5636 = vmatpush3.bf16.msra.mxu0 %v5920_v46  ;;  %5688 = vmatpush3.bf16.msra.mxu1 %v5921_v51 }
 0x2c5   : > { %5637 = vmatprep.subr.bf16.mxu0 %v5922_v16  ;;  %5689 = vmatprep.subr.bf16.mxu1 %v6005_v14 }
 0x2c6   : > { %5703 = vmatprep.mubr.msk.bf16.mxu1 %vm6006_vm3, %v6005_v14 }
 0x2c8   : > { %5638 = vmatpush3.bf16.msra.mxu0 %v5923_v47  ;;  %5690 = vmatpush3.bf16.msra.mxu1 %v5924_v19 }
 0x2c9   : > { %5707 = vmatprep.subr.bf16.mxu0 %v6005_v14  ;;  %5691 = vmatprep.subr.bf16.mxu1 %v6005_v14 }
 0x2cb   : > { %4822 = vmatmul.mubr.bf16.vlgmr.msra.gmra.mrb[56].mxu0 %v4070_v29 }
 0x2cc   : > { %5723 = vmatprep.mubr.msk.bf16.mxu0 %vm6006_vm3, %v6005_v14  ;;  %5692 = vmatpush3.bf16.msra.mxu1 %v5925_v25 }
 0x2cd   : > { %5693 = vmatprep.subr.bf16.mxu1 %v6005_v14  ;;  %5708 = vmatpush3.bf16.msra.mxu0 %v5931_v53 }
 0x2ce   : > { %5709 = vmatprep.subr.bf16.mxu0 %v6005_v14 }
 0x2d0   : > { %5694 = vmatpush3.bf16.msra.mxu1 %v5926_v2 }
 0x2d1   : > { %5695 = vmatprep.subr.bf16.mxu1 %v6005_v14  ;;  %5710 = vmatpush3.bf16.msra.mxu0 %v5932_v30 }
 0x2d2   : > { %5711 = vmatprep.subr.bf16.mxu0 %v6005_v14 }
 0x2d4   : > { %5696 = vmatpush3.bf16.msra.mxu1 %v5927_v20 }
 0x2d5   : > { %5697 = vmatprep.subr.bf16.mxu1 %v6005_v14  ;;  %5712 = vmatpush3.bf16.msra.mxu0 %v5933_v42 }
 0x2d6   : > { %5713 = vmatprep.subr.bf16.mxu0 %v6005_v14 }
 0x2d8   : > { %5698 = vmatpush3.bf16.msra.mxu1 %v5928_v0 }
 0x2d9   : > { %5699 = vmatprep.subr.bf16.mxu1 %v6005_v14  ;;  %5714 = vmatpush3.bf16.msra.mxu0 %v5934_v50 }
 0x2da   : > { %5715 = vmatprep.subr.bf16.mxu0 %v6005_v14 }
 0x2dc   : > { %5700 = vmatpush3.bf16.msra.mxu1 %v5929_v61 }
 0x2dd   : > { %5701 = vmatprep.subr.bf16.mxu1 %v6005_v14  ;;  %5716 = vmatpush3.bf16.msra.mxu0 %v5935_v8 }
 0x2de   : > { %5717 = vmatprep.subr.bf16.mxu0 %v6005_v14 }
 0x2e0   : > { %5702 = vmatpush3.bf16.msra.mxu1 %v5930_v11 }
 0x2e1   : > { %5718 = vmatpush3.bf16.msra.mxu0 %v5936_v24 }
 0x2e2   : > { %5719 = vmatprep.subr.bf16.mxu0 %v6005_v14 }
 0x2e3   : > { %5704 = vmatmul.mubr.bf16.vlgmr.msra.gmra.mrb[56].mxu1 %v4084_v32 }
 0x2e5   : > { %5720 = vmatpush3.bf16.msra.mxu0 %v5937_v7 }
 0x2e6   : > { %5721 = vmatprep.subr.bf16.mxu0 %v6005_v14 }
 0x2e9   : > { %5722 = vmatpush3.bf16.msra.mxu0 %v5938_v10 }
 0x376   : > { %v5573_v55 = vpop.f32.mrb[48].mxu1 }
 0x377   : > { %v5574_v49 = vpop.f32.mrb[49].mxu1 }
 0x378   : > { %v5575_v37 = vadd.f32 %v5574_v49, %v5573_v55  ;;  %v5576_v52 = vpop.f32.mrb[50].mxu1 }
 0x379   : > { %v5577_v12 = vpop.f32.mrb[51].mxu1 }
 0x37a   : > { %v4704_v22 = vadd.f32 %v5575_v37, %v5243_v31 }
 0x37e   : > { %v5595_v58 = vpop.f32.mrb[52].mxu0 }
 0x37f   : > { %v5596_v1 = vpop.f32.mrb[53].mxu0 }
 0x380   : > { %v5597_v56 = vadd.f32 %v5596_v1, %v5595_v58  ;;  %v5598_v5 = vpop.f32.mrb[54].mxu0 }
 0x381   : > { %v5599_v34 = vpop.f32.mrb[55].mxu0 }
 0x382   : > { %v4744_v59 = vadd.f32 %v5597_v56, %v4704_v22 }
 0x396   : > { %v5617_v6 = vpop.f32.mrb[52].mxu1 }
 0x397   : > { %v5618_v39 = vpop.f32.mrb[53].mxu1 }
 0x398   : > { %v5619_v23 = vadd.f32 %v5618_v39, %v5617_v6  ;;  %v5620_v57 = vpop.f32.mrb[54].mxu1 }
 0x399   : > { %v5621_v36 = vpop.f32.mrb[55].mxu1 }
 0x39a   : > { %v4784_v54 = vadd.f32 %v5619_v23, %v4744_v59 }
 0x39e   : > { %v5639_v43 = vpop.f32.mrb[56].mxu0 }
 0x39f   : > { %v5640_v40 = vpop.f32.mrb[57].mxu0 }
 0x3a0   : > { %v5641_v18 = vadd.f32 %v5640_v40, %v5639_v43  ;;  %v5642_v35 = vpop.f32.mrb[58].mxu0 }
 0x3a1   : > { %v5643_v17 = vpop.f32.mrb[59].mxu0 }
 0x3a2   : > { %v4824_v13 = vadd.f32 %v5641_v18, %v4784_v54 }
 0x3b6   : > { %v4863_v15 = vpop.f32.mrb[56].mxu1 }
 0x3b7   : > { %v4864_v3 = vadd.f32 %v4863_v15, %v4824_v13  ;;  %v5705_v38 = vpop.f32.mrb[57].mxu1 }
 0x3b8   : > { %v4866_v60 = vpop.f32.mrb[58].mxu1 }
 0x3b9   : > { %v4869_v41 = vmax.f32 %v4864_v3, 0.0  ;;  %v5706_v9 = vpop.f32.mrb[59].mxu1 }
 0x3bb   : > { %v4877_v62 = vrot.slane %v4869_v41, %v7283_v28  ;;  %v4909_v28 = vld [vmem:[%s7604_s8] sm:$0x1] }
 0x3bd   : > { %v4878_v27 = vcombine.high %v4877_v62, %v4877_v62  ;;  %v4881_v21 = vsel %vm3877_vm15, %v4877_v62, -inf }
 0x3bf   : > { %v4882_v33 = vsel %vm3877_vm15, %v4878_v27, -inf }
 0x3c0   : > { %v4883_v26 = vmax.f32 %v4881_v21, %v4882_v33 }
 0x3c2   : > { %v4884_v44 = vsel %vm3877_vm15, %v4883_v26, -inf }
 0x3c3   : > { %v4885_v45 = vrot.slane %v4884_v44, 4 }
 0x3c5   : > { %v4886_v63 = vmax.f32 %v4884_v44, %v4885_v45 }
 0x3c7   : > { %v4887_v48 = vrot.slane %v4886_v63, 2 }
 0x3c9   : > { %v4888_v46 = vmax.f32 %v4886_v63, %v4887_v48 }
 0x3cb   : > { %v4889_v51 = vrot.slane %v4888_v46, 1 }
 0x3cd   : > { %v4890_v16 = vmax.f32 %v4888_v46, %v4889_v51 }
 0x3cf   : > { %v4892_v4 = vpack.c.bf16 %v4890_v16, %v4890_v16 }
 0x3d1   : > { %5724 = vmatmul.mubr.bf16.vlgmr.msra.gmra.mrb[60].mxu0 %v4892_v4 }
 0x4a4   : > { %v4992_v14 = vpop.f32.mrb[60].mxu0 }
 0x4a5   : > { %v4993_v47 = vadd.f32 %v4992_v14, %v4909_v28  ;;  %v5725_v19 = vpop.f32.mrb[61].mxu0 }
 0x4a6   : > { %v4995_v29 = vpop.f32.mrb[62].mxu0 }
 0x4a7   : > { %4998 = vst [vmem:[%s324_s24] sm:$0x1] %v4993_v47  ;;  %v5726_v25 = vpop.f32.mrb[63].mxu0 }
 0x4a8   : > { %5952 = shalt.err (!%p5949_p3)
}
 0x4a9   : > { %s5953_s21 = scalar_lea.hbm %s7554_s28, 16  ;;  %s5957_s24 = scalar_lea.hbm %s7605_s9, 32 }
 0x4aa   : > { %p5954_p4 = scmp.ne.s32.totalorder %s7554_s28, %s5953_s21  ;;  %p5958_p9 = scmp.lt.u32.totalorder %s7554_s28, %s7605_s9 }
 0x4ab   : > { %p5959_p10 = scmp.lt.u32.totalorder %s5957_s24, %s5953_s21  ;;  %p5961_p12 = scmp.lt.u32.totalorder %s5953_s21, %s7554_s28 }
 0x4ac   : > { %p5955_p7 = pnand %p5954_p4, %p6096_p5 }
 0x4ad   : > { %p5960_p11 = por %p5959_p10, %p5958_p9 }
 0x4ae   : > { %p5956_p8 = pneg %p5955_p7 }
 0x4af   : > { %p5962_p13 = por %p5961_p12, %p5960_p11 }
 0x4b1   : > { %p5963_p0 = pnand %p5962_p13, %p5956_p8 }
 0x4b3   : > { %5966 = shalt.err (!%p5963_p0)
}
 0x4b4   : > { %5728 = dma.vmem_to_hbm [thread:$0]  (%p6096_p5), %s7556_s25, 16, %s7554_s28, %s5000_s29  }
 0x4b5 PF: > { %p5734_p1 = scmp.ge.s32.totalorder %s6001_s12, 2  ;;  %s5024_s13 = sand.u32 1, %s5989_s30  }
 0x4b6   : > { %s5025_s14 = scalar_lea.sflag [#allocation3], %s5024_s13 }
 0x4b7   : > { %p5731_p2 = pnand %p5734_p1, %p6100_p6 }
 0x4b9   : > { %5984 = dma.done.wait (!%p5731_p2), %s5025_s14, 16  }
 0x4ba   : > { %5986 = vsyncadd (!%p5731_p2), %s5025_s14, 4294967280  ;;  %p19_p3 = scmp.ge.s32.totalorder %s6083_s15, 4   ;;  %s7612_s30 = smov %s5993_s10 }
 0x4bb   : > { %s7613_s10 = smov %s5997_s11  ;;  %s7614_s11 = smov %s6094_s18 }
 0x4bc   : > { %s7615_s12 = smov %s6083_s15  ;;  %21 = sbr.rel (!%p19_p3) target bundleno = 3 (0x3), region = 91 }
 0x4c3   :  { %5029 = vsyncpa [#allocation3], 1 }
 0x4c4   :  { %5031 = vsyncpa [#allocation3 + $0x1], 1 }

</bundles_post_ra>
